<compile_context>
chip_gen: v7x
topology: tpu7x:2x2x1
jax: 0.10.0
libtpu: 0.0.40
codegen_flags: <defaults>
</compile_context>

<pallas_src>
import functools
import math

import jax
import jax.numpy as jnp
from jax import lax
from jax.experimental import pallas as pl
from jax.experimental.pallas import tpu as pltpu


# ---------------------------------------------------------------------------
# Fused decoder kernel (one batch element per grid step).
# ---------------------------------------------------------------------------
def _decoder_kernel(src_ref, mask_ref,
                    wq_ref, bq_ref, wk_ref, bk_ref, wv_ref, bv_ref,
                    wo_ref, bo_ref, g1_ref, beta1_ref,
                    w1_ref, b1_ref, w2_ref, b2_ref, g2_ref, beta2_ref,
                    wout_ref, bout_ref, out_ref, *, n_heads):
    seq, hid = src_ref.shape[1], src_ref.shape[2]
    head_dim = hid // n_heads

    x = src_ref[0].astype(jnp.float32)                        # (S, H)

    # Additive key mask, hoisted out of the head loop (broadcasts over rows).
    keep = mask_ref[0].astype(jnp.float32)                    # (1, S)
    add_mask = jnp.where(keep > 0.0,
                         jnp.zeros_like(keep),
                         jnp.full_like(keep, -1e10))          # (1, S), f32

    # --- multi-head self-attention -------------------------------------
    xb = x.astype(jnp.bfloat16)
    q = jnp.dot(xb, wq_ref[...], preferred_element_type=jnp.float32) + bq_ref[...]
    k = jnp.dot(xb, wk_ref[...], preferred_element_type=jnp.float32) + bk_ref[...]
    v = jnp.dot(xb, wv_ref[...], preferred_element_type=jnp.float32) + bv_ref[...]

    # Fold 1/sqrt(head_dim) into Q once (removes a [S,S] multiply per head).
    q = q * (1.0 / math.sqrt(head_dim))

    # Per-head outputs are contracted directly against the matching rows of
    # W_o so only H-wide (lane-dense) accumulators are ever formed.
    attn_proj = jnp.zeros((seq, hid), jnp.float32)
    for h in range(n_heads):                                  # static unroll
        lo = h * head_dim
        qh = q[:, lo:lo + head_dim].astype(jnp.bfloat16)      # (S, hd)
        kh = k[:, lo:lo + head_dim].astype(jnp.bfloat16)
        vh = v[:, lo:lo + head_dim].astype(jnp.bfloat16)

        scores = lax.dot_general(qh, kh, (((1,), (1,)), ((), ())),
                                 preferred_element_type=jnp.float32)  # (S, S)
        scores = scores + add_mask
        m = jnp.max(scores, axis=-1, keepdims=True)
        p = jnp.exp(scores - m)
        l = jnp.sum(p, axis=-1, keepdims=True)
        p = p * pl.reciprocal(l, approx=True)

        oh = jnp.dot(p.astype(jnp.bfloat16), vh,
                     preferred_element_type=jnp.float32)       # (S, hd)
        attn_proj = attn_proj + jnp.dot(
            oh.astype(jnp.bfloat16), wo_ref[lo:lo + head_dim, :],
            preferred_element_type=jnp.float32)
    attn_proj = attn_proj + bo_ref[...]

    # --- residual + LayerNorm 1 (f32 vector math) ------------------------
    y = x + attn_proj
    mu = jnp.mean(y, axis=-1, keepdims=True)
    d = y - mu
    var = jnp.mean(d * d, axis=-1, keepdims=True)
    y = d * lax.rsqrt(var + 1e-5) * g1_ref[...] + beta1_ref[...]

    # --- position-wise feed-forward (hidden never leaves VMEM) -----------
    hdn = jnp.dot(y.astype(jnp.bfloat16), w1_ref[...],
                  preferred_element_type=jnp.float32) + b1_ref[...]
    hdn = jnp.maximum(hdn, 0.0)
    ff = jnp.dot(hdn.astype(jnp.bfloat16), w2_ref[...],
                 preferred_element_type=jnp.float32) + b2_ref[...]

    # --- residual + LayerNorm 2 ------------------------------------------
    z = y + ff
    mu2 = jnp.mean(z, axis=-1, keepdims=True)
    d2 = z - mu2
    var2 = jnp.mean(d2 * d2, axis=-1, keepdims=True)
    z = d2 * lax.rsqrt(var2 + 1e-5) * g2_ref[...] + beta2_ref[...]

    # --- fc_out (lane-dense output tile, last dim = output_dim) ----------
    out = jnp.dot(z.astype(jnp.bfloat16), wout_ref[...],
                  preferred_element_type=jnp.float32) + bout_ref[...]
    out_ref[0] = out.astype(out_ref.dtype)


# ---------------------------------------------------------------------------
# Wrapper
# ---------------------------------------------------------------------------
def decoder_forward(enc_src, src_mask, params, n_heads):
    """Pallas forward for Decoder.

    enc_src : (B, S, H) float32
    src_mask: (B, 1, 1, S) float (1 = keep, 0 = masked), as in the tutorial.
    """
    B, S, H = enc_src.shape
    last = params["layers"][-1]        # only the last layer reaches fc_out
    w_out, b_out = params["w_out"], params["b_out"]
    out_dim = w_out.shape[1]

    mask = src_mask.reshape(B, 1, S).astype(jnp.float32)

    weights = [
        last["wq"], last["bq"], last["wk"], last["bk"],
        last["wv"], last["bv"], last["wo"], last["bo"],
        last["ln1_g"], last["ln1_b"],
        last["w1"], last["b1"], last["w2"], last["b2"],
        last["ln2_g"], last["ln2_b"],
        w_out, b_out,
    ]

    def const_spec(a):
        # Full-array block, constant across the batch grid (no re-DMA).
        return pl.BlockSpec(a.shape, lambda b: (0,) * a.ndim)

    in_specs = ([pl.BlockSpec((1, S, H), lambda b: (b, 0, 0)),
                 pl.BlockSpec((1, 1, S), lambda b: (b, 0, 0))]
                + [const_spec(w) for w in weights])

    kernel = functools.partial(_decoder_kernel, n_heads=n_heads)

    return pl.pallas_call(
        kernel,
        out_shape=jax.ShapeDtypeStruct((B, S, out_dim), jnp.float32),
        grid=(B,),
        in_specs=in_specs,
        out_specs=pl.BlockSpec((1, S, out_dim), lambda b: (b, 0, 0)),
        compiler_params=pltpu.CompilerParams(
            dimension_semantics=("parallel",)),
    )(enc_src, mask, *weights)


# ---------------------------------------------------------------------------
# Parameter init (weights pre-transposed to [in, out]; matmul weights in bf16)
# ---------------------------------------------------------------------------
def init_params(key, hid_dim, n_layers, n_heads, pf_dim, output_dim):
    def linear(k, fan_in, fan_out):
        kw, kb = jax.random.split(k)
        w = (jax.random.normal(kw, (fan_in, fan_out), jnp.float32)
             / math.sqrt(fan_in)).astype(jnp.bfloat16)
        b = 0.01 * jax.random.normal(kb, (1, fan_out), jnp.float32)
        return w, b

    keys = jax.random.split(key, n_layers + 1)
    layers = []
    for i in range(n_layers):
        ks = jax.random.split(keys[i], 10)
        wq, bq = linear(ks[0], hid_dim, hid_dim)
        wk, bk = linear(ks[1], hid_dim, hid_dim)
        wv, bv = linear(ks[2], hid_dim, hid_dim)
        wo, bo = linear(ks[3], hid_dim, hid_dim)
        w1, b1 = linear(ks[4], hid_dim, pf_dim)
        w2, b2 = linear(ks[5], pf_dim, hid_dim)
        layers.append(dict(
            wq=wq, bq=bq, wk=wk, bk=bk, wv=wv, bv=bv, wo=wo, bo=bo,
            w1=w1, b1=b1, w2=w2, b2=b2,
            ln1_g=1.0 + 0.1 * jax.random.normal(ks[6], (1, hid_dim), jnp.float32),
            ln1_b=0.1 * jax.random.normal(ks[7], (1, hid_dim), jnp.float32),
            ln2_g=1.0 + 0.1 * jax.random.normal(ks[8], (1, hid_dim), jnp.float32),
            ln2_b=0.1 * jax.random.normal(ks[9], (1, hid_dim), jnp.float32),
        ))
    w_out, b_out = linear(keys[-1], hid_dim, output_dim)
    return dict(layers=layers, w_out=w_out, b_out=b_out)


# ---------------------------------------------------------------------------
# Pure-JAX reference, mirroring the PyTorch module line-by-line
# (including the loop in which every layer reads enc_src).
# ---------------------------------------------------------------------------
def _layer_norm(x, g, b, eps=1e-5):
    mu = jnp.mean(x, axis=-1, keepdims=True)
    var = jnp.mean((x - mu) ** 2, axis=-1, keepdims=True)
    return (x - mu) / jnp.sqrt(var + eps) * g + b


def reference_decoder(enc_src, src_mask, params, n_heads):
    B, S, H = enc_src.shape
    hd = H // n_heads
    f32 = lambda a: a.astype(jnp.float32)
    x = enc_src.astype(jnp.float32)
    mask = src_mask.reshape(B, 1, 1, S)

    trg = None
    for lyr in params["layers"]:
        q = x @ f32(lyr["wq"]) + lyr["bq"]
        k = x @ f32(lyr["wk"]) + lyr["bk"]
        v = x @ f32(lyr["wv"]) + lyr["bv"]
        q = q.reshape(B, S, n_heads, hd).transpose(0, 2, 1, 3)
        k = k.reshape(B, S, n_heads, hd).transpose(0, 2, 1, 3)
        v = v.reshape(B, S, n_heads, hd).transpose(0, 2, 1, 3)
        energy = (q @ k.transpose(0, 1, 3, 2)) / math.sqrt(hd)
        energy = jnp.where(mask > 0, energy, -1e10)
        attn = jax.nn.softmax(energy, axis=-1)
        o = (attn @ v).transpose(0, 2, 1, 3).reshape(B, S, H)
        o = o @ f32(lyr["wo"]) + lyr["bo"]
        y = _layer_norm(x + o, lyr["ln1_g"], lyr["ln1_b"])
        ff = jnp.maximum(y @ f32(lyr["w1"]) + lyr["b1"], 0.0)
        ff = ff @ f32(lyr["w2"]) + lyr["b2"]
        trg = _layer_norm(y + ff, lyr["ln2_g"], lyr["ln2_b"])
    return trg @ f32(params["w_out"]) + params["b_out"]


# ---------------------------------------------------------------------------
if __name__ == "__main__":
    B, S, H = 2, 16, 64
    n_heads, pf_dim, output_dim, n_layers = 4, 128, 128, 3

    key = jax.random.PRNGKey(0)
    k_par, k_src = jax.random.split(key)
    params = init_params(k_par, H, n_layers, n_heads, pf_dim, output_dim)

    enc_src = jax.random.normal(k_src, (B, S, H), jnp.float32)
    # src_mask as in the tutorial: (src != pad).unsqueeze(1).unsqueeze(2)
    valid = jnp.array([S, S - 5])
    src_mask = (jnp.arange(S)[None, :] < valid[:, None]).astype(jnp.float32)
    src_mask = src_mask.reshape(B, 1, 1, S)

    out = decoder_forward(enc_src, src_mask, params, n_heads)
    out = jax.block_until_ready(out)

    ref = reference_decoder(enc_src, src_mask, params, n_heads)
    err = float(jnp.max(jnp.abs(out - ref)))
    if not (bool(jnp.all(jnp.isfinite(out))) and err < 0.2):
        raise AssertionError(f"kernel/reference mismatch: max abs err = {err}")
    print("KERNEL_OK")
</pallas_src>

<mosaic_0001>
module attributes {stable_mosaic.version = 11 : i64} {
  func.func @_decoder_kernel(%arg0: i32, %arg1: memref<1x16x64xf32, #tpu.memory_space<vmem>>, %arg2: memref<1x1x16xf32, #tpu.memory_space<vmem>>, %arg3: memref<64x64xbf16, #tpu.memory_space<vmem>>, %arg4: memref<1x64xf32, #tpu.memory_space<vmem>>, %arg5: memref<64x64xbf16, #tpu.memory_space<vmem>>, %arg6: memref<1x64xf32, #tpu.memory_space<vmem>>, %arg7: memref<64x64xbf16, #tpu.memory_space<vmem>>, %arg8: memref<1x64xf32, #tpu.memory_space<vmem>>, %arg9: memref<64x64xbf16, #tpu.memory_space<vmem>>, %arg10: memref<1x64xf32, #tpu.memory_space<vmem>>, %arg11: memref<1x64xf32, #tpu.memory_space<vmem>>, %arg12: memref<1x64xf32, #tpu.memory_space<vmem>>, %arg13: memref<64x128xbf16, #tpu.memory_space<vmem>>, %arg14: memref<1x128xf32, #tpu.memory_space<vmem>>, %arg15: memref<128x64xbf16, #tpu.memory_space<vmem>>, %arg16: memref<1x64xf32, #tpu.memory_space<vmem>>, %arg17: memref<1x64xf32, #tpu.memory_space<vmem>>, %arg18: memref<1x64xf32, #tpu.memory_space<vmem>>, %arg19: memref<64x128xbf16, #tpu.memory_space<vmem>>, %arg20: memref<1x128xf32, #tpu.memory_space<vmem>>, %arg21: memref<1x16x128xf32, #tpu.memory_space<vmem>>) attributes {dimension_semantics = [#tpu.dimension_semantics<parallel>], iteration_bounds = array<i64: 2>, scalar_prefetch = 0 : i64, scratch_operands = 0 : i64, tpu.core_type = #tpu.core_type<tc>, window_params = [{transform_indices = @transform_0, window_bounds = array<i64: 1, 16, 64>}, {transform_indices = @transform_1, window_bounds = array<i64: 1, 1, 16>}, {pipeline_mode = #tpu.pipeline_mode<synchronous>, transform_indices = @transform_2, window_bounds = array<i64: 64, 64>}, {pipeline_mode = #tpu.pipeline_mode<synchronous>, transform_indices = @transform_3, window_bounds = array<i64: 1, 64>}, {pipeline_mode = #tpu.pipeline_mode<synchronous>, transform_indices = @transform_4, window_bounds = array<i64: 64, 64>}, {pipeline_mode = #tpu.pipeline_mode<synchronous>, transform_indices = @transform_5, window_bounds = array<i64: 1, 64>}, {pipeline_mode = #tpu.pipeline_mode<synchronous>, transform_indices = @transform_6, window_bounds = array<i64: 64, 64>}, {pipeline_mode = #tpu.pipeline_mode<synchronous>, transform_indices = @transform_7, window_bounds = array<i64: 1, 64>}, {pipeline_mode = #tpu.pipeline_mode<synchronous>, transform_indices = @transform_8, window_bounds = array<i64: 64, 64>}, {pipeline_mode = #tpu.pipeline_mode<synchronous>, transform_indices = @transform_9, window_bounds = array<i64: 1, 64>}, {pipeline_mode = #tpu.pipeline_mode<synchronous>, transform_indices = @transform_10, window_bounds = array<i64: 1, 64>}, {pipeline_mode = #tpu.pipeline_mode<synchronous>, transform_indices = @transform_11, window_bounds = array<i64: 1, 64>}, {pipeline_mode = #tpu.pipeline_mode<synchronous>, transform_indices = @transform_12, window_bounds = array<i64: 64, 128>}, {pipeline_mode = #tpu.pipeline_mode<synchronous>, transform_indices = @transform_13, window_bounds = array<i64: 1, 128>}, {pipeline_mode = #tpu.pipeline_mode<synchronous>, transform_indices = @transform_14, window_bounds = array<i64: 128, 64>}, {pipeline_mode = #tpu.pipeline_mode<synchronous>, transform_indices = @transform_15, window_bounds = array<i64: 1, 64>}, {pipeline_mode = #tpu.pipeline_mode<synchronous>, transform_indices = @transform_16, window_bounds = array<i64: 1, 64>}, {pipeline_mode = #tpu.pipeline_mode<synchronous>, transform_indices = @transform_17, window_bounds = array<i64: 1, 64>}, {pipeline_mode = #tpu.pipeline_mode<synchronous>, transform_indices = @transform_18, window_bounds = array<i64: 64, 128>}, {pipeline_mode = #tpu.pipeline_mode<synchronous>, transform_indices = @transform_19, window_bounds = array<i64: 1, 128>}, {transform_indices = @transform_20, window_bounds = array<i64: 1, 16, 128>}]} {
    %c0 = arith.constant 0 : index
    %c0_0 = arith.constant 0 : index
    %c0_1 = arith.constant 0 : index
    %0 = vector.load %arg1[%c0, %c0_0, %c0_1] : memref<1x16x64xf32, #tpu.memory_space<vmem>>, vector<1x16x64xf32>
    %1 = vector.shape_cast %0 : vector<1x16x64xf32> to vector<16x64xf32>
    %c0_2 = arith.constant 0 : index
    %c0_3 = arith.constant 0 : index
    %c0_4 = arith.constant 0 : index
    %2 = vector.load %arg2[%c0_2, %c0_3, %c0_4] : memref<1x1x16xf32, #tpu.memory_space<vmem>>, vector<1x1x16xf32>
    %3 = vector.shape_cast %2 : vector<1x1x16xf32> to vector<1x16xf32>
    %cst = arith.constant 0.000000e+00 : f32
    %4 = vector.broadcast %cst : f32 to vector<1x16xf32>
    %5 = arith.cmpf ogt, %3, %4 : vector<1x16xf32>
    %cst_5 = arith.constant 0.000000e+00 : f32
    %6 = vector.broadcast %cst_5 : f32 to vector<1x16xf32>
    %cst_6 = arith.constant -1.000000e+10 : f32
    %7 = vector.broadcast %cst_6 : f32 to vector<1x16xf32>
    %8 = arith.select %5, %6, %7 : vector<1x16xi1>, vector<1x16xf32>
    %9 = arith.truncf %1 : vector<16x64xf32> to vector<16x64xbf16>
    %c0_7 = arith.constant 0 : index
    %c0_8 = arith.constant 0 : index
    %10 = vector.load %arg3[%c0_7, %c0_8] : memref<64x64xbf16, #tpu.memory_space<vmem>>, vector<64x64xbf16>
    %cst_9 = arith.constant dense<0.000000e+00> : vector<16x64xf32>
    %11 = tpu.matmul %9, %10, %cst_9 {dimension_numbers = #tpu.dot_dimension_numbers<[1], [0], [0], [1], [0, 0, 1, 1], [], []>} : vector<16x64xbf16>, vector<64x64xbf16>, vector<16x64xf32> -> vector<16x64xf32>
    %c0_10 = arith.constant 0 : index
    %c0_11 = arith.constant 0 : index
    %12 = vector.load %arg4[%c0_10, %c0_11] : memref<1x64xf32, #tpu.memory_space<vmem>>, vector<1x64xf32>
    %13 = vector.broadcast %12 : vector<1x64xf32> to vector<16x64xf32>
    %14 = arith.addf %11, %13 : vector<16x64xf32>
    %c0_12 = arith.constant 0 : index
    %c0_13 = arith.constant 0 : index
    %15 = vector.load %arg5[%c0_12, %c0_13] : memref<64x64xbf16, #tpu.memory_space<vmem>>, vector<64x64xbf16>
    %cst_14 = arith.constant dense<0.000000e+00> : vector<16x64xf32>
    %16 = tpu.matmul %9, %15, %cst_14 {dimension_numbers = #tpu.dot_dimension_numbers<[1], [0], [0], [1], [0, 0, 1, 1], [], []>} : vector<16x64xbf16>, vector<64x64xbf16>, vector<16x64xf32> -> vector<16x64xf32>
    %c0_15 = arith.constant 0 : index
    %c0_16 = arith.constant 0 : index
    %17 = vector.load %arg6[%c0_15, %c0_16] : memref<1x64xf32, #tpu.memory_space<vmem>>, vector<1x64xf32>
    %18 = vector.broadcast %17 : vector<1x64xf32> to vector<16x64xf32>
    %19 = arith.addf %16, %18 : vector<16x64xf32>
    %c0_17 = arith.constant 0 : index
    %c0_18 = arith.constant 0 : index
    %20 = vector.load %arg7[%c0_17, %c0_18] : memref<64x64xbf16, #tpu.memory_space<vmem>>, vector<64x64xbf16>
    %cst_19 = arith.constant dense<0.000000e+00> : vector<16x64xf32>
    %21 = tpu.matmul %9, %20, %cst_19 {dimension_numbers = #tpu.dot_dimension_numbers<[1], [0], [0], [1], [0, 0, 1, 1], [], []>} : vector<16x64xbf16>, vector<64x64xbf16>, vector<16x64xf32> -> vector<16x64xf32>
    %c0_20 = arith.constant 0 : index
    %c0_21 = arith.constant 0 : index
    %22 = vector.load %arg8[%c0_20, %c0_21] : memref<1x64xf32, #tpu.memory_space<vmem>>, vector<1x64xf32>
    %23 = vector.broadcast %22 : vector<1x64xf32> to vector<16x64xf32>
    %24 = arith.addf %21, %23 : vector<16x64xf32>
    %cst_22 = arith.constant 2.500000e-01 : f32
    %25 = vector.broadcast %cst_22 : f32 to vector<16x64xf32>
    %26 = arith.mulf %14, %25 : vector<16x64xf32>
    %cst_23 = arith.constant 0.000000e+00 : f32
    %27 = vector.broadcast %cst_23 : f32 to vector<16x64xf32>
    %28 = vector.extract_strided_slice %26 {offsets = [0, 0], sizes = [16, 16], strides = [1, 1]} : vector<16x64xf32> to vector<16x16xf32>
    %29 = arith.truncf %28 : vector<16x16xf32> to vector<16x16xbf16>
    %30 = vector.extract_strided_slice %19 {offsets = [0, 0], sizes = [16, 16], strides = [1, 1]} : vector<16x64xf32> to vector<16x16xf32>
    %31 = arith.truncf %30 : vector<16x16xf32> to vector<16x16xbf16>
    %32 = vector.extract_strided_slice %24 {offsets = [0, 0], sizes = [16, 16], strides = [1, 1]} : vector<16x64xf32> to vector<16x16xf32>
    %33 = arith.truncf %32 : vector<16x16xf32> to vector<16x16xbf16>
    %cst_24 = arith.constant dense<0.000000e+00> : vector<16x16xf32>
    %34 = tpu.matmul %29, %31, %cst_24 {dimension_numbers = #tpu.dot_dimension_numbers<[1], [1], [0], [0], [0, 0, 1, 0], [], []>} : vector<16x16xbf16>, vector<16x16xbf16>, vector<16x16xf32> -> vector<16x16xf32>
    %35 = vector.broadcast %8 : vector<1x16xf32> to vector<16x16xf32>
    %36 = arith.addf %34, %35 : vector<16x16xf32>
    %cst_25 = arith.constant dense<0xFF800000> : vector<16xf32>
    %37 = vector.multi_reduction <maximumf>, %36, %cst_25 [1] : vector<16x16xf32> to vector<16xf32>
    %38 = vector.shape_cast %37 : vector<16xf32> to vector<16x1xf32>
    %39 = vector.broadcast %38 : vector<16x1xf32> to vector<16x16xf32>
    %40 = arith.subf %36, %39 : vector<16x16xf32>
    %41 = math.exp %40 : vector<16x16xf32>
    %cst_26 = arith.constant dense<0.000000e+00> : vector<16xf32>
    %42 = vector.multi_reduction <add>, %41, %cst_26 [1] : vector<16x16xf32> to vector<16xf32>
    %43 = vector.shape_cast %42 : vector<16xf32> to vector<16x1xf32>
    %44 = tpu.reciprocal %43 {approx = true} : vector<16x1xf32> -> vector<16x1xf32>
    %45 = vector.broadcast %44 : vector<16x1xf32> to vector<16x16xf32>
    %46 = arith.mulf %41, %45 : vector<16x16xf32>
    %47 = arith.truncf %46 : vector<16x16xf32> to vector<16x16xbf16>
    %cst_27 = arith.constant dense<0.000000e+00> : vector<16x16xf32>
    %48 = tpu.matmul %47, %33, %cst_27 {dimension_numbers = #tpu.dot_dimension_numbers<[1], [0], [0], [1], [0, 0, 1, 1], [], []>} : vector<16x16xbf16>, vector<16x16xbf16>, vector<16x16xf32> -> vector<16x16xf32>
    %49 = arith.truncf %48 : vector<16x16xf32> to vector<16x16xbf16>
    %c0_28 = arith.constant 0 : index
    %c0_29 = arith.constant 0 : index
    %50 = vector.load %arg9[%c0_28, %c0_29] : memref<64x64xbf16, #tpu.memory_space<vmem>>, vector<16x64xbf16>
    %cst_30 = arith.constant dense<0.000000e+00> : vector<16x64xf32>
    %51 = tpu.matmul %49, %50, %cst_30 {dimension_numbers = #tpu.dot_dimension_numbers<[1], [0], [0], [1], [0, 0, 1, 1], [], []>} : vector<16x16xbf16>, vector<16x64xbf16>, vector<16x64xf32> -> vector<16x64xf32>
    %52 = arith.addf %27, %51 : vector<16x64xf32>
    %53 = vector.extract_strided_slice %26 {offsets = [0, 16], sizes = [16, 16], strides = [1, 1]} : vector<16x64xf32> to vector<16x16xf32>
    %54 = arith.truncf %53 : vector<16x16xf32> to vector<16x16xbf16>
    %55 = vector.extract_strided_slice %19 {offsets = [0, 16], sizes = [16, 16], strides = [1, 1]} : vector<16x64xf32> to vector<16x16xf32>
    %56 = arith.truncf %55 : vector<16x16xf32> to vector<16x16xbf16>
    %57 = vector.extract_strided_slice %24 {offsets = [0, 16], sizes = [16, 16], strides = [1, 1]} : vector<16x64xf32> to vector<16x16xf32>
    %58 = arith.truncf %57 : vector<16x16xf32> to vector<16x16xbf16>
    %cst_31 = arith.constant dense<0.000000e+00> : vector<16x16xf32>
    %59 = tpu.matmul %54, %56, %cst_31 {dimension_numbers = #tpu.dot_dimension_numbers<[1], [1], [0], [0], [0, 0, 1, 0], [], []>} : vector<16x16xbf16>, vector<16x16xbf16>, vector<16x16xf32> -> vector<16x16xf32>
    %60 = vector.broadcast %8 : vector<1x16xf32> to vector<16x16xf32>
    %61 = arith.addf %59, %60 : vector<16x16xf32>
    %cst_32 = arith.constant dense<0xFF800000> : vector<16xf32>
    %62 = vector.multi_reduction <maximumf>, %61, %cst_32 [1] : vector<16x16xf32> to vector<16xf32>
    %63 = vector.shape_cast %62 : vector<16xf32> to vector<16x1xf32>
    %64 = vector.broadcast %63 : vector<16x1xf32> to vector<16x16xf32>
    %65 = arith.subf %61, %64 : vector<16x16xf32>
    %66 = math.exp %65 : vector<16x16xf32>
    %cst_33 = arith.constant dense<0.000000e+00> : vector<16xf32>
    %67 = vector.multi_reduction <add>, %66, %cst_33 [1] : vector<16x16xf32> to vector<16xf32>
    %68 = vector.shape_cast %67 : vector<16xf32> to vector<16x1xf32>
    %69 = tpu.reciprocal %68 {approx = true} : vector<16x1xf32> -> vector<16x1xf32>
    %70 = vector.broadcast %69 : vector<16x1xf32> to vector<16x16xf32>
    %71 = arith.mulf %66, %70 : vector<16x16xf32>
    %72 = arith.truncf %71 : vector<16x16xf32> to vector<16x16xbf16>
    %cst_34 = arith.constant dense<0.000000e+00> : vector<16x16xf32>
    %73 = tpu.matmul %72, %58, %cst_34 {dimension_numbers = #tpu.dot_dimension_numbers<[1], [0], [0], [1], [0, 0, 1, 1], [], []>} : vector<16x16xbf16>, vector<16x16xbf16>, vector<16x16xf32> -> vector<16x16xf32>
    %74 = arith.truncf %73 : vector<16x16xf32> to vector<16x16xbf16>
    %c16 = arith.constant 16 : index
    %c0_35 = arith.constant 0 : index
    %75 = vector.load %arg9[%c16, %c0_35] : memref<64x64xbf16, #tpu.memory_space<vmem>>, vector<16x64xbf16>
    %cst_36 = arith.constant dense<0.000000e+00> : vector<16x64xf32>
    %76 = tpu.matmul %74, %75, %cst_36 {dimension_numbers = #tpu.dot_dimension_numbers<[1], [0], [0], [1], [0, 0, 1, 1], [], []>} : vector<16x16xbf16>, vector<16x64xbf16>, vector<16x64xf32> -> vector<16x64xf32>
    %77 = arith.addf %52, %76 : vector<16x64xf32>
    %78 = vector.extract_strided_slice %26 {offsets = [0, 32], sizes = [16, 16], strides = [1, 1]} : vector<16x64xf32> to vector<16x16xf32>
    %79 = arith.truncf %78 : vector<16x16xf32> to vector<16x16xbf16>
    %80 = vector.extract_strided_slice %19 {offsets = [0, 32], sizes = [16, 16], strides = [1, 1]} : vector<16x64xf32> to vector<16x16xf32>
    %81 = arith.truncf %80 : vector<16x16xf32> to vector<16x16xbf16>
    %82 = vector.extract_strided_slice %24 {offsets = [0, 32], sizes = [16, 16], strides = [1, 1]} : vector<16x64xf32> to vector<16x16xf32>
    %83 = arith.truncf %82 : vector<16x16xf32> to vector<16x16xbf16>
    %cst_37 = arith.constant dense<0.000000e+00> : vector<16x16xf32>
    %84 = tpu.matmul %79, %81, %cst_37 {dimension_numbers = #tpu.dot_dimension_numbers<[1], [1], [0], [0], [0, 0, 1, 0], [], []>} : vector<16x16xbf16>, vector<16x16xbf16>, vector<16x16xf32> -> vector<16x16xf32>
    %85 = vector.broadcast %8 : vector<1x16xf32> to vector<16x16xf32>
    %86 = arith.addf %84, %85 : vector<16x16xf32>
    %cst_38 = arith.constant dense<0xFF800000> : vector<16xf32>
    %87 = vector.multi_reduction <maximumf>, %86, %cst_38 [1] : vector<16x16xf32> to vector<16xf32>
    %88 = vector.shape_cast %87 : vector<16xf32> to vector<16x1xf32>
    %89 = vector.broadcast %88 : vector<16x1xf32> to vector<16x16xf32>
    %90 = arith.subf %86, %89 : vector<16x16xf32>
    %91 = math.exp %90 : vector<16x16xf32>
    %cst_39 = arith.constant dense<0.000000e+00> : vector<16xf32>
    %92 = vector.multi_reduction <add>, %91, %cst_39 [1] : vector<16x16xf32> to vector<16xf32>
    %93 = vector.shape_cast %92 : vector<16xf32> to vector<16x1xf32>
    %94 = tpu.reciprocal %93 {approx = true} : vector<16x1xf32> -> vector<16x1xf32>
    %95 = vector.broadcast %94 : vector<16x1xf32> to vector<16x16xf32>
    %96 = arith.mulf %91, %95 : vector<16x16xf32>
    %97 = arith.truncf %96 : vector<16x16xf32> to vector<16x16xbf16>
    %cst_40 = arith.constant dense<0.000000e+00> : vector<16x16xf32>
    %98 = tpu.matmul %97, %83, %cst_40 {dimension_numbers = #tpu.dot_dimension_numbers<[1], [0], [0], [1], [0, 0, 1, 1], [], []>} : vector<16x16xbf16>, vector<16x16xbf16>, vector<16x16xf32> -> vector<16x16xf32>
    %99 = arith.truncf %98 : vector<16x16xf32> to vector<16x16xbf16>
    %c32 = arith.constant 32 : index
    %c0_41 = arith.constant 0 : index
    %100 = vector.load %arg9[%c32, %c0_41] : memref<64x64xbf16, #tpu.memory_space<vmem>>, vector<16x64xbf16>
    %cst_42 = arith.constant dense<0.000000e+00> : vector<16x64xf32>
    %101 = tpu.matmul %99, %100, %cst_42 {dimension_numbers = #tpu.dot_dimension_numbers<[1], [0], [0], [1], [0, 0, 1, 1], [], []>} : vector<16x16xbf16>, vector<16x64xbf16>, vector<16x64xf32> -> vector<16x64xf32>
    %102 = arith.addf %77, %101 : vector<16x64xf32>
    %103 = vector.extract_strided_slice %26 {offsets = [0, 48], sizes = [16, 16], strides = [1, 1]} : vector<16x64xf32> to vector<16x16xf32>
    %104 = arith.truncf %103 : vector<16x16xf32> to vector<16x16xbf16>
    %105 = vector.extract_strided_slice %19 {offsets = [0, 48], sizes = [16, 16], strides = [1, 1]} : vector<16x64xf32> to vector<16x16xf32>
    %106 = arith.truncf %105 : vector<16x16xf32> to vector<16x16xbf16>
    %107 = vector.extract_strided_slice %24 {offsets = [0, 48], sizes = [16, 16], strides = [1, 1]} : vector<16x64xf32> to vector<16x16xf32>
    %108 = arith.truncf %107 : vector<16x16xf32> to vector<16x16xbf16>
    %cst_43 = arith.constant dense<0.000000e+00> : vector<16x16xf32>
    %109 = tpu.matmul %104, %106, %cst_43 {dimension_numbers = #tpu.dot_dimension_numbers<[1], [1], [0], [0], [0, 0, 1, 0], [], []>} : vector<16x16xbf16>, vector<16x16xbf16>, vector<16x16xf32> -> vector<16x16xf32>
    %110 = vector.broadcast %8 : vector<1x16xf32> to vector<16x16xf32>
    %111 = arith.addf %109, %110 : vector<16x16xf32>
    %cst_44 = arith.constant dense<0xFF800000> : vector<16xf32>
    %112 = vector.multi_reduction <maximumf>, %111, %cst_44 [1] : vector<16x16xf32> to vector<16xf32>
    %113 = vector.shape_cast %112 : vector<16xf32> to vector<16x1xf32>
    %114 = vector.broadcast %113 : vector<16x1xf32> to vector<16x16xf32>
    %115 = arith.subf %111, %114 : vector<16x16xf32>
    %116 = math.exp %115 : vector<16x16xf32>
    %cst_45 = arith.constant dense<0.000000e+00> : vector<16xf32>
    %117 = vector.multi_reduction <add>, %116, %cst_45 [1] : vector<16x16xf32> to vector<16xf32>
    %118 = vector.shape_cast %117 : vector<16xf32> to vector<16x1xf32>
    %119 = tpu.reciprocal %118 {approx = true} : vector<16x1xf32> -> vector<16x1xf32>
    %120 = vector.broadcast %119 : vector<16x1xf32> to vector<16x16xf32>
    %121 = arith.mulf %116, %120 : vector<16x16xf32>
    %122 = arith.truncf %121 : vector<16x16xf32> to vector<16x16xbf16>
    %cst_46 = arith.constant dense<0.000000e+00> : vector<16x16xf32>
    %123 = tpu.matmul %122, %108, %cst_46 {dimension_numbers = #tpu.dot_dimension_numbers<[1], [0], [0], [1], [0, 0, 1, 1], [], []>} : vector<16x16xbf16>, vector<16x16xbf16>, vector<16x16xf32> -> vector<16x16xf32>
    %124 = arith.truncf %123 : vector<16x16xf32> to vector<16x16xbf16>
    %c48 = arith.constant 48 : index
    %c0_47 = arith.constant 0 : index
    %125 = vector.load %arg9[%c48, %c0_47] : memref<64x64xbf16, #tpu.memory_space<vmem>>, vector<16x64xbf16>
    %cst_48 = arith.constant dense<0.000000e+00> : vector<16x64xf32>
    %126 = tpu.matmul %124, %125, %cst_48 {dimension_numbers = #tpu.dot_dimension_numbers<[1], [0], [0], [1], [0, 0, 1, 1], [], []>} : vector<16x16xbf16>, vector<16x64xbf16>, vector<16x64xf32> -> vector<16x64xf32>
    %127 = arith.addf %102, %126 : vector<16x64xf32>
    %c0_49 = arith.constant 0 : index
    %c0_50 = arith.constant 0 : index
    %128 = vector.load %arg10[%c0_49, %c0_50] : memref<1x64xf32, #tpu.memory_space<vmem>>, vector<1x64xf32>
    %129 = vector.broadcast %128 : vector<1x64xf32> to vector<16x64xf32>
    %130 = arith.addf %127, %129 : vector<16x64xf32>
    %131 = arith.addf %1, %130 : vector<16x64xf32>
    %cst_51 = arith.constant dense<0.000000e+00> : vector<16xf32>
    %132 = vector.multi_reduction <add>, %131, %cst_51 [1] : vector<16x64xf32> to vector<16xf32>
    %133 = vector.shape_cast %132 : vector<16xf32> to vector<16x1xf32>
    %cst_52 = arith.constant 6.400000e+01 : f32
    %134 = vector.broadcast %cst_52 : f32 to vector<16x1xf32>
    %135 = arith.divf %133, %134 : vector<16x1xf32>
    %136 = vector.broadcast %135 : vector<16x1xf32> to vector<16x64xf32>
    %137 = arith.subf %131, %136 : vector<16x64xf32>
    %138 = arith.mulf %137, %137 : vector<16x64xf32>
    %cst_53 = arith.constant dense<0.000000e+00> : vector<16xf32>
    %139 = vector.multi_reduction <add>, %138, %cst_53 [1] : vector<16x64xf32> to vector<16xf32>
    %140 = vector.shape_cast %139 : vector<16xf32> to vector<16x1xf32>
    %cst_54 = arith.constant 6.400000e+01 : f32
    %141 = vector.broadcast %cst_54 : f32 to vector<16x1xf32>
    %142 = arith.divf %140, %141 : vector<16x1xf32>
    %cst_55 = arith.constant 9.99999974E-6 : f32
    %143 = vector.broadcast %cst_55 : f32 to vector<16x1xf32>
    %144 = arith.addf %142, %143 : vector<16x1xf32>
    %145 = math.rsqrt %144 : vector<16x1xf32>
    %146 = vector.broadcast %145 : vector<16x1xf32> to vector<16x64xf32>
    %147 = arith.mulf %137, %146 : vector<16x64xf32>
    %c0_56 = arith.constant 0 : index
    %c0_57 = arith.constant 0 : index
    %148 = vector.load %arg11[%c0_56, %c0_57] : memref<1x64xf32, #tpu.memory_space<vmem>>, vector<1x64xf32>
    %149 = vector.broadcast %148 : vector<1x64xf32> to vector<16x64xf32>
    %150 = arith.mulf %147, %149 : vector<16x64xf32>
    %c0_58 = arith.constant 0 : index
    %c0_59 = arith.constant 0 : index
    %151 = vector.load %arg12[%c0_58, %c0_59] : memref<1x64xf32, #tpu.memory_space<vmem>>, vector<1x64xf32>
    %152 = vector.broadcast %151 : vector<1x64xf32> to vector<16x64xf32>
    %153 = arith.addf %150, %152 : vector<16x64xf32>
    %154 = arith.truncf %153 : vector<16x64xf32> to vector<16x64xbf16>
    %c0_60 = arith.constant 0 : index
    %c0_61 = arith.constant 0 : index
    %155 = vector.load %arg13[%c0_60, %c0_61] : memref<64x128xbf16, #tpu.memory_space<vmem>>, vector<64x128xbf16>
    %cst_62 = arith.constant dense<0.000000e+00> : vector<16x128xf32>
    %156 = tpu.matmul %154, %155, %cst_62 {dimension_numbers = #tpu.dot_dimension_numbers<[1], [0], [0], [1], [0, 0, 1, 1], [], []>} : vector<16x64xbf16>, vector<64x128xbf16>, vector<16x128xf32> -> vector<16x128xf32>
    %c0_63 = arith.constant 0 : index
    %c0_64 = arith.constant 0 : index
    %157 = vector.load %arg14[%c0_63, %c0_64] : memref<1x128xf32, #tpu.memory_space<vmem>>, vector<1x128xf32>
    %158 = vector.broadcast %157 : vector<1x128xf32> to vector<16x128xf32>
    %159 = arith.addf %156, %158 : vector<16x128xf32>
    %cst_65 = arith.constant 0.000000e+00 : f32
    %160 = vector.broadcast %cst_65 : f32 to vector<16x128xf32>
    %161 = arith.maximumf %159, %160 : vector<16x128xf32>
    %162 = arith.truncf %161 : vector<16x128xf32> to vector<16x128xbf16>
    %c0_66 = arith.constant 0 : index
    %c0_67 = arith.constant 0 : index
    %163 = vector.load %arg15[%c0_66, %c0_67] : memref<128x64xbf16, #tpu.memory_space<vmem>>, vector<128x64xbf16>
    %cst_68 = arith.constant dense<0.000000e+00> : vector<16x64xf32>
    %164 = tpu.matmul %162, %163, %cst_68 {dimension_numbers = #tpu.dot_dimension_numbers<[1], [0], [0], [1], [0, 0, 1, 1], [], []>} : vector<16x128xbf16>, vector<128x64xbf16>, vector<16x64xf32> -> vector<16x64xf32>
    %c0_69 = arith.constant 0 : index
    %c0_70 = arith.constant 0 : index
    %165 = vector.load %arg16[%c0_69, %c0_70] : memref<1x64xf32, #tpu.memory_space<vmem>>, vector<1x64xf32>
    %166 = vector.broadcast %165 : vector<1x64xf32> to vector<16x64xf32>
    %167 = arith.addf %164, %166 : vector<16x64xf32>
    %168 = arith.addf %153, %167 : vector<16x64xf32>
    %cst_71 = arith.constant dense<0.000000e+00> : vector<16xf32>
    %169 = vector.multi_reduction <add>, %168, %cst_71 [1] : vector<16x64xf32> to vector<16xf32>
    %170 = vector.shape_cast %169 : vector<16xf32> to vector<16x1xf32>
    %cst_72 = arith.constant 6.400000e+01 : f32
    %171 = vector.broadcast %cst_72 : f32 to vector<16x1xf32>
    %172 = arith.divf %170, %171 : vector<16x1xf32>
    %173 = vector.broadcast %172 : vector<16x1xf32> to vector<16x64xf32>
    %174 = arith.subf %168, %173 : vector<16x64xf32>
    %175 = arith.mulf %174, %174 : vector<16x64xf32>
    %cst_73 = arith.constant dense<0.000000e+00> : vector<16xf32>
    %176 = vector.multi_reduction <add>, %175, %cst_73 [1] : vector<16x64xf32> to vector<16xf32>
    %177 = vector.shape_cast %176 : vector<16xf32> to vector<16x1xf32>
    %cst_74 = arith.constant 6.400000e+01 : f32
    %178 = vector.broadcast %cst_74 : f32 to vector<16x1xf32>
    %179 = arith.divf %177, %178 : vector<16x1xf32>
    %cst_75 = arith.constant 9.99999974E-6 : f32
    %180 = vector.broadcast %cst_75 : f32 to vector<16x1xf32>
    %181 = arith.addf %179, %180 : vector<16x1xf32>
    %182 = math.rsqrt %181 : vector<16x1xf32>
    %183 = vector.broadcast %182 : vector<16x1xf32> to vector<16x64xf32>
    %184 = arith.mulf %174, %183 : vector<16x64xf32>
    %c0_76 = arith.constant 0 : index
    %c0_77 = arith.constant 0 : index
    %185 = vector.load %arg17[%c0_76, %c0_77] : memref<1x64xf32, #tpu.memory_space<vmem>>, vector<1x64xf32>
    %186 = vector.broadcast %185 : vector<1x64xf32> to vector<16x64xf32>
    %187 = arith.mulf %184, %186 : vector<16x64xf32>
    %c0_78 = arith.constant 0 : index
    %c0_79 = arith.constant 0 : index
    %188 = vector.load %arg18[%c0_78, %c0_79] : memref<1x64xf32, #tpu.memory_space<vmem>>, vector<1x64xf32>
    %189 = vector.broadcast %188 : vector<1x64xf32> to vector<16x64xf32>
    %190 = arith.addf %187, %189 : vector<16x64xf32>
    %191 = arith.truncf %190 : vector<16x64xf32> to vector<16x64xbf16>
    %c0_80 = arith.constant 0 : index
    %c0_81 = arith.constant 0 : index
    %192 = vector.load %arg19[%c0_80, %c0_81] : memref<64x128xbf16, #tpu.memory_space<vmem>>, vector<64x128xbf16>
    %cst_82 = arith.constant dense<0.000000e+00> : vector<16x128xf32>
    %193 = tpu.matmul %191, %192, %cst_82 {dimension_numbers = #tpu.dot_dimension_numbers<[1], [0], [0], [1], [0, 0, 1, 1], [], []>} : vector<16x64xbf16>, vector<64x128xbf16>, vector<16x128xf32> -> vector<16x128xf32>
    %c0_83 = arith.constant 0 : index
    %c0_84 = arith.constant 0 : index
    %194 = vector.load %arg20[%c0_83, %c0_84] : memref<1x128xf32, #tpu.memory_space<vmem>>, vector<1x128xf32>
    %195 = vector.broadcast %194 : vector<1x128xf32> to vector<16x128xf32>
    %196 = arith.addf %193, %195 : vector<16x128xf32>
    %c0_85 = arith.constant 0 : index
    %c0_86 = arith.constant 0 : index
    %c0_87 = arith.constant 0 : index
    %197 = vector.load %arg21[%c0_85, %c0_86, %c0_87] : memref<1x16x128xf32, #tpu.memory_space<vmem>>, vector<1x16x128xf32>
    %198 = vector.shape_cast %197 : vector<1x16x128xf32> to vector<16x128xf32>
    %199 = vector.shape_cast %196 : vector<16x128xf32> to vector<1x16x128xf32>
    tpu.vector_store %arg21[%c0_85, %c0_86, %c0_87], %199 {strides = array<i32>} : memref<1x16x128xf32, #tpu.memory_space<vmem>>, vector<1x16x128xf32>,
    return
  }
  func.func @transform_0(%arg0: i32) -> (i32, i32, i32) {
    %c0_i32 = arith.constant 0 : i32
    %c0_i32_0 = arith.constant 0 : i32
    %c0_i32_1 = arith.constant 0 : i32
    return %arg0, %c0_i32, %c0_i32_0 : i32, i32, i32
  }
  func.func @transform_1(%arg0: i32) -> (i32, i32, i32) {
    %c0_i32 = arith.constant 0 : i32
    %c0_i32_0 = arith.constant 0 : i32
    %c0_i32_1 = arith.constant 0 : i32
    return %arg0, %c0_i32, %c0_i32_0 : i32, i32, i32
  }
  func.func @transform_2(%arg0: i32) -> (i32, i32) {
    %c0_i32 = arith.constant 0 : i32
    %c0_i32_0 = arith.constant 0 : i32
    %c0_i32_1 = arith.constant 0 : i32
    return %c0_i32, %c0_i32_0 : i32, i32
  }
  func.func @transform_3(%arg0: i32) -> (i32, i32) {
    %c0_i32 = arith.constant 0 : i32
    %c0_i32_0 = arith.constant 0 : i32
    %c0_i32_1 = arith.constant 0 : i32
    return %c0_i32, %c0_i32_0 : i32, i32
  }
  func.func @transform_4(%arg0: i32) -> (i32, i32) {
    %c0_i32 = arith.constant 0 : i32
    %c0_i32_0 = arith.constant 0 : i32
    %c0_i32_1 = arith.constant 0 : i32
    return %c0_i32, %c0_i32_0 : i32, i32
  }
  func.func @transform_5(%arg0: i32) -> (i32, i32) {
    %c0_i32 = arith.constant 0 : i32
    %c0_i32_0 = arith.constant 0 : i32
    %c0_i32_1 = arith.constant 0 : i32
    return %c0_i32, %c0_i32_0 : i32, i32
  }
  func.func @transform_6(%arg0: i32) -> (i32, i32) {
    %c0_i32 = arith.constant 0 : i32
    %c0_i32_0 = arith.constant 0 : i32
    %c0_i32_1 = arith.constant 0 : i32
    return %c0_i32, %c0_i32_0 : i32, i32
  }
  func.func @transform_7(%arg0: i32) -> (i32, i32) {
    %c0_i32 = arith.constant 0 : i32
    %c0_i32_0 = arith.constant 0 : i32
    %c0_i32_1 = arith.constant 0 : i32
    return %c0_i32, %c0_i32_0 : i32, i32
  }
  func.func @transform_8(%arg0: i32) -> (i32, i32) {
    %c0_i32 = arith.constant 0 : i32
    %c0_i32_0 = arith.constant 0 : i32
    %c0_i32_1 = arith.constant 0 : i32
    return %c0_i32, %c0_i32_0 : i32, i32
  }
  func.func @transform_9(%arg0: i32) -> (i32, i32) {
    %c0_i32 = arith.constant 0 : i32
    %c0_i32_0 = arith.constant 0 : i32
    %c0_i32_1 = arith.constant 0 : i32
    return %c0_i32, %c0_i32_0 : i32, i32
  }
  func.func @transform_10(%arg0: i32) -> (i32, i32) {
    %c0_i32 = arith.constant 0 : i32
    %c0_i32_0 = arith.constant 0 : i32
    %c0_i32_1 = arith.constant 0 : i32
    return %c0_i32, %c0_i32_0 : i32, i32
  }
  func.func @transform_11(%arg0: i32) -> (i32, i32) {
    %c0_i32 = arith.constant 0 : i32
    %c0_i32_0 = arith.constant 0 : i32
    %c0_i32_1 = arith.constant 0 : i32
    return %c0_i32, %c0_i32_0 : i32, i32
  }
  func.func @transform_12(%arg0: i32) -> (i32, i32) {
    %c0_i32 = arith.constant 0 : i32
    %c0_i32_0 = arith.constant 0 : i32
    %c0_i32_1 = arith.constant 0 : i32
    return %c0_i32, %c0_i32_0 : i32, i32
  }
  func.func @transform_13(%arg0: i32) -> (i32, i32) {
    %c0_i32 = arith.constant 0 : i32
    %c0_i32_0 = arith.constant 0 : i32
    %c0_i32_1 = arith.constant 0 : i32
    return %c0_i32, %c0_i32_0 : i32, i32
  }
  func.func @transform_14(%arg0: i32) -> (i32, i32) {
    %c0_i32 = arith.constant 0 : i32
    %c0_i32_0 = arith.constant 0 : i32
    %c0_i32_1 = arith.constant 0 : i32
    return %c0_i32, %c0_i32_0 : i32, i32
  }
  func.func @transform_15(%arg0: i32) -> (i32, i32) {
    %c0_i32 = arith.constant 0 : i32
    %c0_i32_0 = arith.constant 0 : i32
    %c0_i32_1 = arith.constant 0 : i32
    return %c0_i32, %c0_i32_0 : i32, i32
  }
  func.func @transform_16(%arg0: i32) -> (i32, i32) {
    %c0_i32 = arith.constant 0 : i32
    %c0_i32_0 = arith.constant 0 : i32
    %c0_i32_1 = arith.constant 0 : i32
    return %c0_i32, %c0_i32_0 : i32, i32
  }
  func.func @transform_17(%arg0: i32) -> (i32, i32) {
    %c0_i32 = arith.constant 0 : i32
    %c0_i32_0 = arith.constant 0 : i32
    %c0_i32_1 = arith.constant 0 : i32
    return %c0_i32, %c0_i32_0 : i32, i32
  }
  func.func @transform_18(%arg0: i32) -> (i32, i32) {
    %c0_i32 = arith.constant 0 : i32
    %c0_i32_0 = arith.constant 0 : i32
    %c0_i32_1 = arith.constant 0 : i32
    return %c0_i32, %c0_i32_0 : i32, i32
  }
  func.func @transform_19(%arg0: i32) -> (i32, i32) {
    %c0_i32 = arith.constant 0 : i32
    %c0_i32_0 = arith.constant 0 : i32
    %c0_i32_1 = arith.constant 0 : i32
    return %c0_i32, %c0_i32_0 : i32, i32
  }
  func.func @transform_20(%arg0: i32) -> (i32, i32, i32) {
    %c0_i32 = arith.constant 0 : i32
    %c0_i32_0 = arith.constant 0 : i32
    %c0_i32_1 = arith.constant 0 : i32
    return %arg0, %c0_i32, %c0_i32_0 : i32, i32, i32
  }
}

</mosaic_0001>

<bundles_post_ra>
// kernel: tpu_custom_call.1
= control target key start
LH: loop header
LB: loop body
LE: loop exit
PB: predicated region body
PF: predicated region fallthrough
CT: control target
= control target key end

     0   :  { %s4298_s0 = inlined_call_operand.vmem [shape: f32[2,16,64], index: 0, kind: input, shape index: {}]   ;;  %s4299_s1 = inlined_call_operand.hbm [shape: f32[2,1,16], index: 1, kind: input, shape index: {}]   ;;  %s4300_s2 = inlined_call_operand.vmem [shape: bf16[64,64], index: 2, kind: input, shape index: {}]   ;;  %s4301_s3 = inlined_call_operand.hbm [shape: f32[1,64], index: 3, kind: input, shape index: {}]   ;;  %s4302_s4 = inlined_call_operand.vmem [shape: bf16[64,64], index: 4, kind: input, shape index: {}]   ;;  %s4303_s5 = inlined_call_operand.hbm [shape: f32[1,64], index: 5, kind: input, shape index: {}]   ;;  %s4304_s6 = inlined_call_operand.hbm [shape: bf16[64,64], index: 6, kind: input, shape index: {}]   ;;  %s4305_s7 = inlined_call_operand.hbm [shape: f32[1,64], index: 7, kind: input, shape index: {}]   ;;  %s4306_s8 = inlined_call_operand.hbm [shape: bf16[64,64], index: 8, kind: input, shape index: {}]   ;;  %s4307_s9 = inlined_call_operand.hbm [shape: f32[1,64], index: 9, kind: input, shape index: {}]   ;;  %s4308_s10 = inlined_call_operand.hbm [shape: f32[1,64], index: 10, kind: input, shape index: {}]   ;;  %s4309_s11 = inlined_call_operand.hbm [shape: f32[1,64], index: 11, kind: input, shape index: {}]   ;;  %s4310_s12 = inlined_call_operand.hbm [shape: bf16[64,128], index: 12, kind: input, shape index: {}]   ;;  %s4311_s13 = inlined_call_operand.hbm [shape: f32[1,128], index: 13, kind: input, shape index: {}]   ;;  %s4312_s14 = inlined_call_operand.vmem [shape: bf16[128,64], index: 14, kind: input, shape index: {}]   ;;  %s4313_s15 = inlined_call_operand.hbm [shape: f32[1,64], index: 15, kind: input, shape index: {}]   ;;  %s4314_s16 = inlined_call_operand.hbm [shape: f32[1,64], index: 16, kind: input, shape index: {}]   ;;  %s4315_s17 = inlined_call_operand.hbm [shape: f32[1,64], index: 17, kind: input, shape index: {}]   ;;  %s4316_s18 = inlined_call_operand.vmem [shape: bf16[64,128], index: 18, kind: input, shape index: {}]   ;;  %s4317_s19 = inlined_call_operand.vmem [shape: f32[1,128], index: 19, kind: input, shape index: {}]   ;;  %s4318_s20 = inlined_call_operand.hbm [shape: f32[2,16,128], index: 20, kind: output, shape index: {}]  }
   0x1   :  { %4335 = sst [smem:[#allocation38_spill]] %s4298_s0 }
   0x2   :  { %4336 = sst [smem:[#allocation39_spill]] %s4299_s1 }
   0x3   :  { %4337 = sst [smem:[#allocation40_spill]] %s4300_s2 }
   0x4   :  { %4338 = sst [smem:[#allocation41_spill]] %s4301_s3 }
   0x5   :  { %4339 = sst [smem:[#allocation42_spill]] %s4302_s4 }
   0x6   :  { %4340 = sst [smem:[#allocation43_spill]] %s4303_s5 }
   0x7   :  { %4341 = sst [smem:[#allocation44_spill]] %s4304_s6 }
   0x8   :  { %4342 = sst [smem:[#allocation45_spill]] %s4305_s7 }
   0x9   :  { %4343 = sst [smem:[#allocation46_spill]] %s4306_s8 }
   0xa   :  { %4344 = sst [smem:[#allocation47_spill]] %s4307_s9 }
   0xb   :  { %4345 = sst [smem:[#allocation48_spill]] %s4312_s14 }
   0xc   :  { %4346 = sst [smem:[#allocation49_spill]] %s4316_s18 }
   0xd   :  { %4347 = sst [smem:[#allocation50_spill]] %s4317_s19 }
   0xe   :  { %4348 = sst [smem:[#allocation51_spill]] %s4318_s20 }
   0xf   :  { %25 = vsyncpa [#allocation3], 0 }
  0x10   :  { %27 = vsyncpa [#allocation3 + $0x1], 0 }
  0x11   :  { %28 = vsyncpa [#allocation6], 0 }
  0x12   :  { %29 = vsyncpa [#allocation9], 0 }
  0x13   :  { %30 = vsyncpa [#allocation12], 0 }
  0x14   :  { %31 = vsyncpa [#allocation15], 0 }
  0x15   :  { %32 = vsyncpa [#allocation18], 0 }
  0x16   :  { %33 = vsyncpa [#allocation21], 0 }
  0x17   :  { %34 = vsyncpa [#allocation24], 0 }
  0x18   :  { %35 = vsyncpa [#allocation4], 0 }
  0x19   :  { %37 = vsyncpa [#allocation4 + $0x1], 0  ;;  %s3587_s1 = smov 0   ;;  %s3589_s22 = smov 0  }
  0x1a   :  { %s3591_s23 = smov 0   ;;  %s3593_s24 = smov 0  }
  0x1b LB: > { %4349 = sst [smem:[#allocation35_spill]] %s3443_s1  ;;  %s3457_s2 = smov [#allocation5]   ;;  %s3455_s24 = sphi %s3593_s24, %s4401_s24   ;;  %s3451_s23 = sphi %s3591_s23, %s4400_s23   ;;  %s3447_s22 = sphi %s3589_s22, %s4399_s22   ;;  %s3443_s1 = sphi %s3587_s1, %s4398_s1  }
  0x1c   : > { %s520_s25 = sshll.u32 %s3457_s2, 4  ;;  %s3608_s3 = sadd.s32 4294967295, %s3455_s24   ;;  %s3613_s25 = int_to_ptr.vmem [resolvable:$true] %s520_s25 }
  0x1d   : > { %4350 = sst [smem:[#allocation36_spill]] %s3608_s3  ;;  %p2398_p0 = scmp.ge.s32.totalorder %s3455_s24, 1 }
  0x1e   : > { %p4331_p1 = scmp.eq.s32.totalorder %s3608_s3, 0  ;;  %p504_p2 = scmp.lt.s32.totalorder %s3455_s24, 3 }
  0x1f   : > { %s3458_s27 = smov [#allocation8]   ;;  %s3459_s29 = smov [#allocation11]  }
  0x20   : > { %p3615_p3 = pnand %p2398_p0, %p504_p2  ;;  %s544_s28 = sshll.u32 %s3458_s27, 4  ;;  %s3622_s28 = int_to_ptr.vmem [resolvable:$true] %s544_s28 }
  0x21   : > { %s568_s30 = sshll.u32 %s3459_s29, 4  ;;  %s4354_s2 = sld [smem:[#allocation41_spill]]  ;;  %s3630_s30 = int_to_ptr.vmem [resolvable:$true] %s568_s30 }
  0x22   : > { %s4351_s26 = scalar_select %p3615_p3, 1, 0 }
  0x23   : > { %p2764_p5 = pneg %p3615_p3 }
  0x24   : > { %4352 = sst [smem:[#allocation37_spill]] %s4351_s26 }
  0x25   : > { %p3626_p6 = pnand %p2764_p5, %p4331_p1 }
  0x27   : > { %s2967_s20 = scalar_lea.hbm %s4354_s2, 16  ;;  %p3640_p8 = pneg %p3626_p6 }
  0x28   : > { %p2968_p7 = scmp.ne.s32.totalorder %s4354_s2, %s2967_s20  ;;  %p2974_p11 = scmp.lt.u32.totalorder %s2967_s20, %s4354_s2 }
  0x2a   : > { %p2970_p9 = pnand %p3640_p8, %p2968_p7 }
  0x2c   : > { %p2971_p10 = pneg %p2970_p9 }
  0x2e   : > { %p2976_p12 = pnand %p2974_p11, %p2971_p10 }
  0x30   : > { %2979 = shalt.err (!%p2976_p12)
}
  0x31   : > { %s2980_s18 = scalar_lea.vmem %s3613_s25, 16  ;;  %s2987_s19 = scalar_lea.vmem %s3613_s25, 32 }
  0x32   : > { %p2981_p13 = scmp.ne.s32.totalorder %s3613_s25, %s2980_s18  ;;  %p2988_p5 = scmp.lt.s32.totalorder %s3613_s25, %s3613_s25 }
  0x33   : > { %p2989_p7 = scmp.lt.s32.totalorder %s2987_s19, %s2980_s18 }
  0x34   : > { %p2983_p0 = pnand %p2981_p13, %p3640_p8 }
  0x35   : > { %p2990_p9 = por %p2989_p7, %p2988_p5 }
  0x36   : > { %p2984_p2 = pneg %p2983_p0 }
  0x38   : > { %p2991_p4 = pnand %p2990_p9, %p2984_p2 }
  0x3a   : > { %2994 = shalt.err (!%p2991_p4)
}
  0x3b   : > { %2767 = dma.hbm_to_vmem [thread:$0]  (!%p3626_p6), %s4354_s2, 16, %s3613_s25, [#allocation6]  }
  0x3c   : > { %s4356_s6 = sld [smem:[#allocation44_spill]] }
  0x42   : > { %s2995_s29 = scalar_lea.hbm %s4356_s6, 512 }
  0x43   : > { %p2996_p10 = scmp.ne.s32.totalorder %s4356_s6, %s2995_s29  ;;  %p3002_p4 = scmp.lt.u32.totalorder %s2995_s29, %s4356_s6 }
  0x45   : > { %p2998_p11 = pnand %p2996_p10, %p3640_p8 }
  0x47   : > { %p2999_p12 = pneg %p2998_p11 }
  0x49   : > { %p3004_p13 = pnand %p3002_p4, %p2999_p12 }
  0x4b   : > { %3007 = shalt.err (!%p3004_p13)
}
  0x4c   : > { %s3008_s25 = scalar_lea.vmem %s3622_s28, 512  ;;  %p3016_p7 = scmp.lt.s32.totalorder %s3622_s28, %s3622_s28 }
  0x4d   : > { %p3009_p0 = scmp.ne.s32.totalorder %s3622_s28, %s3008_s25  ;;  %p3017_p9 = scmp.lt.s32.totalorder %s3008_s25, %s3008_s25 }
  0x4f   : > { %p3011_p2 = pnand %p3009_p0, %p3640_p8  ;;  %p3018_p10 = por %p3017_p9, %p3016_p7 }
  0x51   : > { %p3012_p5 = pneg %p3011_p2 }
  0x53   : > { %p3019_p11 = pnand %p3018_p10, %p3012_p5 }
  0x55   : > { %3022 = shalt.err (!%p3019_p11)
}
  0x56   : > { %s3460_s3 = smov 64   ;;  %s3461_s26 = smov 4  }
  0x57   : > { %2773 = dma.hbm_to_vmem [thread:$0]  (!%p3626_p6), %s4356_s6, 512, %s3622_s28, [#allocation9], %s3460_s3, %s3460_s3, %s3461_s26  }
  0x58   : > { %s4357_s8 = sld [smem:[#allocation46_spill]] }
  0x5e   : > { %s3023_s29 = scalar_lea.hbm %s4357_s8, 512 }
  0x5f   : > { %p3024_p12 = scmp.ne.s32.totalorder %s4357_s8, %s3023_s29  ;;  %p3030_p0 = scmp.lt.u32.totalorder %s3023_s29, %s4357_s8 }
  0x61   : > { %p3026_p4 = pnand %p3024_p12, %p3640_p8 }
  0x63   : > { %p3027_p13 = pneg %p3026_p4 }
  0x65   : > { %p3032_p2 = pnand %p3030_p0, %p3027_p13 }
  0x67   : > { %3035 = shalt.err (!%p3032_p2)
}
  0x68   : > { %s3036_s28 = scalar_lea.vmem %s3630_s30, 512  ;;  %p3044_p10 = scmp.lt.s32.totalorder %s3630_s30, %s3630_s30 }
  0x69   : > { %p3037_p5 = scmp.ne.s32.totalorder %s3630_s30, %s3036_s28  ;;  %p3045_p11 = scmp.lt.s32.totalorder %s3036_s28, %s3036_s28 }
  0x6b   : > { %p3039_p7 = pnand %p3037_p5, %p3640_p8  ;;  %p3046_p12 = por %p3045_p11, %p3044_p10 }
  0x6d   : > { %p3040_p9 = pneg %p3039_p7 }
  0x6f   : > { %p3047_p4 = pnand %p3046_p12, %p3040_p9 }
  0x71   : > { %3050 = shalt.err (!%p3047_p4)
}
  0x72   : > { %2779 = dma.hbm_to_vmem [thread:$0]  (!%p3626_p6), %s4357_s8, 512, %s3630_s30, [#allocation12], %s3460_s3, %s3460_s3, %s3461_s26  }
  0x73   : > { %s3462_s20 = smov [#allocation14]   ;;  %s3463_s21 = smov [#allocation17]  }
  0x74   : > { %s593_s0 = sshll.u32 %s3462_s20, 4  ;;  %s614_s29 = sshll.u32 %s3463_s21, 4  ;;  %s594_s0 = int_to_ptr.vmem [resolvable:$true] %s593_s0  ;;  %s615_s29 = int_to_ptr.vmem [resolvable:$true] %s614_s29 }
  0x75   : > { %s3051_s25 = scalar_lea.hbm %s4308_s10, 16 }
  0x76   : > { %p3052_p13 = scmp.ne.s32.totalorder %s4308_s10, %s3051_s25  ;;  %p3058_p5 = scmp.lt.u32.totalorder %s3051_s25, %s4308_s10 }
  0x78   : > { %p3054_p0 = pnand %p3052_p13, %p3640_p8 }
  0x7a   : > { %p3055_p2 = pneg %p3054_p0 }
  0x7c   : > { %p3060_p7 = pnand %p3058_p5, %p3055_p2 }
  0x7e   : > { %3063 = shalt.err (!%p3060_p7)
}
  0x7f   : > { %s3064_s30 = scalar_lea.vmem %s594_s0, 16  ;;  %s3071_s14 = scalar_lea.vmem %s594_s0, 32 }
  0x80   : > { %p3065_p9 = scmp.ne.s32.totalorder %s594_s0, %s3064_s30  ;;  %p3072_p12 = scmp.lt.s32.totalorder %s594_s0, %s594_s0 }
  0x81   : > { %p3073_p4 = scmp.lt.s32.totalorder %s3071_s14, %s3064_s30 }
  0x82   : > { %p3067_p10 = pnand %p3065_p9, %p3640_p8 }
  0x83   : > { %p3074_p1 = por %p3073_p4, %p3072_p12 }
  0x84   : > { %p3068_p11 = pneg %p3067_p10 }
  0x86   : > { %p3075_p3 = pnand %p3074_p1, %p3068_p11 }
  0x88   : > { %3078 = shalt.err (!%p3075_p3)
}
  0x89   : > { %2785 = dma.hbm_to_vmem [thread:$0]  (!%p3626_p6), %s4308_s10, 16, %s594_s0, [#allocation15]  }
  0x8a   : > { %s3079_s18 = scalar_lea.hbm %s4310_s12, 512 }
  0x8b   : > { %p3080_p13 = scmp.ne.s32.totalorder %s4310_s12, %s3079_s18  ;;  %p3086_p3 = scmp.lt.u32.totalorder %s3079_s18, %s4310_s12 }
  0x8d   : > { %p3082_p0 = pnand %p3080_p13, %p3640_p8 }
  0x8f   : > { %p3083_p1 = pneg %p3082_p0 }
  0x91   : > { %p3088_p2 = pnand %p3086_p3, %p3083_p1 }
  0x93   : > { %3091 = shalt.err (!%p3088_p2)
}
  0x94   : > { %s3092_s30 = scalar_lea.vmem %s615_s29, 512  ;;  %p3100_p10 = scmp.lt.s32.totalorder %s615_s29, %s615_s29 }
  0x95   : > { %p3093_p5 = scmp.ne.s32.totalorder %s615_s29, %s3092_s30  ;;  %p3101_p11 = scmp.lt.s32.totalorder %s3092_s30, %s3092_s30 }
  0x97   : > { %p3095_p7 = pnand %p3093_p5, %p3640_p8  ;;  %p3102_p12 = por %p3101_p11, %p3100_p10 }
  0x99   : > { %p3096_p9 = pneg %p3095_p7 }
  0x9b   : > { %p3103_p4 = pnand %p3102_p12, %p3096_p9 }
  0x9d   : > { %3106 = shalt.err (!%p3103_p4)
}
  0x9e   : > { %2791 = dma.hbm_to_vmem [thread:$0]  (!%p3626_p6), %s4310_s12, 512, %s615_s29, [#allocation18], %s3460_s3, %s3460_s3, %s3461_s26  }
  0x9f   : > { %s3464_s6 = smov [#allocation20]   ;;  %s3465_s1 = smov [#allocation7]  }
  0xa0   : > { %s642_s20 = sshll.u32 %s3464_s6, 4  ;;  %s534_s21 = sshll.u32 %s3465_s1, 4  ;;  %s643_s20 = int_to_ptr.vmem [resolvable:$true] %s642_s20  ;;  %s535_s21 = int_to_ptr.vmem [resolvable:$true] %s534_s21 }
  0xa1   : > { %s3107_s25 = scalar_lea.hbm %s4313_s15, 16 }
  0xa2   : > { %p3108_p13 = scmp.ne.s32.totalorder %s4313_s15, %s3107_s25  ;;  %p3114_p3 = scmp.lt.u32.totalorder %s3107_s25, %s4313_s15 }
  0xa4   : > { %p3110_p0 = pnand %p3108_p13, %p3640_p8 }
  0xa6   : > { %p3111_p1 = pneg %p3110_p0 }
  0xa8   : > { %p3116_p2 = pnand %p3114_p3, %p3111_p1 }
  0xaa   : > { %3119 = shalt.err (!%p3116_p2)
}
  0xab   : > { %s3120_s3 = scalar_lea.vmem %s643_s20, 16  ;;  %s3127_s26 = scalar_lea.vmem %s643_s20, 32 }
  0xac   : > { %p3121_p5 = scmp.ne.s32.totalorder %s643_s20, %s3120_s3  ;;  %p3128_p10 = scmp.lt.s32.totalorder %s643_s20, %s643_s20 }
  0xad   : > { %p3129_p11 = scmp.lt.s32.totalorder %s3127_s26, %s3120_s3 }
  0xae   : > { %p3123_p7 = pnand %p3121_p5, %p3640_p8 }
  0xaf   : > { %p3130_p12 = por %p3129_p11, %p3128_p10 }
  0xb0   : > { %p3124_p9 = pneg %p3123_p7 }
  0xb2   : > { %p3131_p4 = pnand %p3130_p12, %p3124_p9 }
  0xb4   : > { %3134 = shalt.err (!%p3131_p4)
}
  0xb5   : > { %2797 = dma.hbm_to_vmem [thread:$0]  (!%p3626_p6), %s4313_s15, 16, %s643_s20, [#allocation21]  }
  0xb6   : > { %s4358_s5 = sld [smem:[#allocation43_spill]] }
  0xbc   : > { %s3135_s18 = scalar_lea.hbm %s4358_s5, 16 }
  0xbd   : > { %p3136_p13 = scmp.ne.s32.totalorder %s4358_s5, %s3135_s18  ;;  %p3142_p3 = scmp.lt.u32.totalorder %s3135_s18, %s4358_s5 }
  0xbf   : > { %p3138_p0 = pnand %p3136_p13, %p3640_p8 }
  0xc1   : > { %p3139_p1 = pneg %p3138_p0 }
  0xc3   : > { %p3144_p2 = pnand %p3142_p3, %p3139_p1 }
  0xc5   : > { %3147 = shalt.err (!%p3144_p2)
}
  0xc6   : > { %s3148_s30 = scalar_lea.vmem %s535_s21, 16  ;;  %s3155_s20 = scalar_lea.vmem %s535_s21, 32 }
  0xc7   : > { %p3149_p5 = scmp.ne.s32.totalorder %s535_s21, %s3148_s30  ;;  %p3156_p10 = scmp.lt.s32.totalorder %s535_s21, %s535_s21 }
  0xc8   : > { %p3157_p11 = scmp.lt.s32.totalorder %s3155_s20, %s3148_s30 }
  0xc9   : > { %p3151_p7 = pnand %p3149_p5, %p3640_p8 }
  0xca   : > { %p3158_p12 = por %p3157_p11, %p3156_p10 }
  0xcb   : > { %p3152_p9 = pneg %p3151_p7 }
  0xcd   : > { %p3159_p4 = pnand %p3158_p12, %p3152_p9 }
  0xcf   : > { %3162 = shalt.err (!%p3159_p4)
}
  0xd0   : > { %2770 = dma.hbm_to_vmem [thread:$0]  (!%p3626_p6), %s4358_s5, 16, %s535_s21, [#allocation6]  }
  0xd1   : > { %s3466_s26 = smov [#allocation10]   ;;  %s3467_s14 = smov [#allocation13]  }
  0xd2   : > { %s558_s29 = sshll.u32 %s3466_s26, 4  ;;  %s582_s6 = sshll.u32 %s3467_s14, 4  ;;  %s559_s29 = int_to_ptr.vmem [resolvable:$true] %s558_s29  ;;  %s583_s6 = int_to_ptr.vmem [resolvable:$true] %s582_s6 }
  0xd3   : > { %s4359_s7 = sld [smem:[#allocation45_spill]] }
  0xd9   : > { %s3163_s19 = scalar_lea.hbm %s4359_s7, 16 }
  0xda   : > { %p3164_p13 = scmp.ne.s32.totalorder %s4359_s7, %s3163_s19  ;;  %p3170_p3 = scmp.lt.u32.totalorder %s3163_s19, %s4359_s7 }
  0xdc   : > { %p3166_p0 = pnand %p3164_p13, %p3640_p8 }
  0xde   : > { %p3167_p1 = pneg %p3166_p0 }
  0xe0   : > { %p3172_p2 = pnand %p3170_p3, %p3167_p1 }
  0xe2   : > { %3175 = shalt.err (!%p3172_p2)
}
  0xe3   : > { %s3176_s21 = scalar_lea.vmem %s559_s29, 16  ;;  %s3183_s20 = scalar_lea.vmem %s559_s29, 32 }
  0xe4   : > { %p3177_p5 = scmp.ne.s32.totalorder %s559_s29, %s3176_s21  ;;  %p3184_p10 = scmp.lt.s32.totalorder %s559_s29, %s559_s29 }
  0xe5   : > { %p3185_p11 = scmp.lt.s32.totalorder %s3183_s20, %s3176_s21 }
  0xe6   : > { %p3179_p7 = pnand %p3177_p5, %p3640_p8 }
  0xe7   : > { %p3186_p12 = por %p3185_p11, %p3184_p10 }
  0xe8   : > { %p3180_p9 = pneg %p3179_p7 }
  0xea   : > { %p3187_p4 = pnand %p3186_p12, %p3180_p9 }
  0xec   : > { %3190 = shalt.err (!%p3187_p4)
}
  0xed   : > { %2776 = dma.hbm_to_vmem [thread:$0]  (!%p3626_p6), %s4359_s7, 16, %s559_s29, [#allocation9]  }
  0xee   : > { %s4360_s9 = sld [smem:[#allocation47_spill]] }
  0xf4   : > { %s3191_s1 = scalar_lea.hbm %s4360_s9, 16 }
  0xf5   : > { %p3192_p13 = scmp.ne.s32.totalorder %s4360_s9, %s3191_s1  ;;  %p3198_p3 = scmp.lt.u32.totalorder %s3191_s1, %s4360_s9 }
  0xf7   : > { %p3194_p0 = pnand %p3192_p13, %p3640_p8 }
  0xf9   : > { %p3195_p1 = pneg %p3194_p0 }
  0xfb   : > { %p3200_p2 = pnand %p3198_p3, %p3195_p1 }
  0xfd   : > { %3203 = shalt.err (!%p3200_p2)
}
  0xfe   : > { %s3204_s2 = scalar_lea.vmem %s583_s6, 16  ;;  %s3211_s29 = scalar_lea.vmem %s583_s6, 32 }
  0xff   : > { %p3205_p5 = scmp.ne.s32.totalorder %s583_s6, %s3204_s2  ;;  %p3212_p10 = scmp.lt.s32.totalorder %s583_s6, %s583_s6 }
 0x100   : > { %p3213_p11 = scmp.lt.s32.totalorder %s3211_s29, %s3204_s2 }
 0x101   : > { %p3207_p7 = pnand %p3205_p5, %p3640_p8 }
 0x102   : > { %p3214_p12 = por %p3213_p11, %p3212_p10 }
 0x103   : > { %p3208_p9 = pneg %p3207_p7 }
 0x105   : > { %p3215_p4 = pnand %p3214_p12, %p3208_p9 }
 0x107   : > { %3218 = shalt.err (!%p3215_p4)
}
 0x108   : > { %2782 = dma.hbm_to_vmem [thread:$0]  (!%p3626_p6), %s4360_s9, 16, %s583_s6, [#allocation12]  }
 0x109   : > { %s3468_s20 = smov [#allocation16]   ;;  %s3469_s3 = smov [#allocation19]  }
 0x10a   : > { %s604_s0 = sshll.u32 %s3468_s20, 4  ;;  %s628_s26 = sshll.u32 %s3469_s3, 4  ;;  %s605_s0 = int_to_ptr.vmem [resolvable:$true] %s604_s0  ;;  %s629_s26 = int_to_ptr.vmem [resolvable:$true] %s628_s26 }
 0x10b   : > { %s3219_s18 = scalar_lea.hbm %s4309_s11, 16 }
 0x10c   : > { %p3220_p13 = scmp.ne.s32.totalorder %s4309_s11, %s3219_s18  ;;  %p3226_p3 = scmp.lt.u32.totalorder %s3219_s18, %s4309_s11 }
 0x10e   : > { %p3222_p0 = pnand %p3220_p13, %p3640_p8 }
 0x110   : > { %p3223_p1 = pneg %p3222_p0 }
 0x112   : > { %p3228_p2 = pnand %p3226_p3, %p3223_p1 }
 0x114   : > { %3231 = shalt.err (!%p3228_p2)
}
 0x115   : > { %s3232_s6 = scalar_lea.vmem %s605_s0, 16  ;;  %s3239_s29 = scalar_lea.vmem %s605_s0, 32 }
 0x116   : > { %p3233_p5 = scmp.ne.s32.totalorder %s605_s0, %s3232_s6  ;;  %p3240_p10 = scmp.lt.s32.totalorder %s605_s0, %s605_s0 }
 0x117   : > { %p3241_p11 = scmp.lt.s32.totalorder %s3239_s29, %s3232_s6 }
 0x118   : > { %p3235_p7 = pnand %p3233_p5, %p3640_p8 }
 0x119   : > { %p3242_p12 = por %p3241_p11, %p3240_p10 }
 0x11a   : > { %p3236_p9 = pneg %p3235_p7 }
 0x11c   : > { %p3243_p4 = pnand %p3242_p12, %p3236_p9 }
 0x11e   : > { %3246 = shalt.err (!%p3243_p4)
}
 0x11f   : > { %2788 = dma.hbm_to_vmem [thread:$0]  (!%p3626_p6), %s4309_s11, 16, %s605_s0, [#allocation15]  }
 0x120   : > { %s3247_s14 = scalar_lea.hbm %s4311_s13, 16 }
 0x121   : > { %p3248_p13 = scmp.ne.s32.totalorder %s4311_s13, %s3247_s14  ;;  %p3254_p3 = scmp.lt.u32.totalorder %s3247_s14, %s4311_s13 }
 0x123   : > { %p3250_p0 = pnand %p3248_p13, %p3640_p8 }
 0x125   : > { %p3251_p1 = pneg %p3250_p0 }
 0x127   : > { %p3256_p2 = pnand %p3254_p3, %p3251_p1 }
 0x129   : > { %3259 = shalt.err (!%p3256_p2)
}
 0x12a   : > { %s3260_s28 = scalar_lea.vmem %s629_s26, 16  ;;  %s3267_s0 = scalar_lea.vmem %s629_s26, 32 }
 0x12b   : > { %p3261_p5 = scmp.ne.s32.totalorder %s629_s26, %s3260_s28  ;;  %p3268_p10 = scmp.lt.s32.totalorder %s629_s26, %s629_s26 }
 0x12c   : > { %p3269_p11 = scmp.lt.s32.totalorder %s3267_s0, %s3260_s28 }
 0x12d   : > { %p3263_p7 = pnand %p3261_p5, %p3640_p8 }
 0x12e   : > { %p3270_p12 = por %p3269_p11, %p3268_p10 }
 0x12f   : > { %p3264_p9 = pneg %p3263_p7 }
 0x131   : > { %p3271_p4 = pnand %p3270_p12, %p3264_p9 }
 0x133   : > { %3274 = shalt.err (!%p3271_p4)
}
 0x134   : > { %2794 = dma.hbm_to_vmem [thread:$0]  (!%p3626_p6), %s4311_s13, 16, %s629_s26, [#allocation18]  }
 0x135   : > { %s3470_s29 = smov [#allocation22]   ;;  %s3471_s21 = smov [#allocation23]  }
 0x136   : > { %s653_s30 = sshll.u32 %s3470_s29, 4  ;;  %s664_s20 = sshll.u32 %s3471_s21, 4  ;;  %s654_s30 = int_to_ptr.vmem [resolvable:$true] %s653_s30  ;;  %s665_s20 = int_to_ptr.vmem [resolvable:$true] %s664_s20 }
 0x137   : > { %s3275_s1 = scalar_lea.hbm %s4314_s16, 16 }
 0x138   : > { %p3276_p13 = scmp.ne.s32.totalorder %s4314_s16, %s3275_s1  ;;  %p3282_p3 = scmp.lt.u32.totalorder %s3275_s1, %s4314_s16 }
 0x13a   : > { %p3278_p0 = pnand %p3276_p13, %p3640_p8 }
 0x13c   : > { %p3279_p1 = pneg %p3278_p0 }
 0x13e   : > { %p3284_p2 = pnand %p3282_p3, %p3279_p1 }
 0x140   : > { %3287 = shalt.err (!%p3284_p2)
}
 0x141   : > { %s3288_s26 = scalar_lea.vmem %s654_s30, 16  ;;  %s3295_s0 = scalar_lea.vmem %s654_s30, 32 }
 0x142   : > { %p3289_p5 = scmp.ne.s32.totalorder %s654_s30, %s3288_s26  ;;  %p3296_p10 = scmp.lt.s32.totalorder %s654_s30, %s654_s30 }
 0x143   : > { %p3297_p11 = scmp.lt.s32.totalorder %s3295_s0, %s3288_s26 }
 0x144   : > { %p3291_p7 = pnand %p3289_p5, %p3640_p8 }
 0x145   : > { %p3298_p12 = por %p3297_p11, %p3296_p10 }
 0x146   : > { %p3292_p9 = pneg %p3291_p7 }
 0x148   : > { %p3299_p4 = pnand %p3298_p12, %p3292_p9 }
 0x14a   : > { %3302 = shalt.err (!%p3299_p4)
}
 0x14b   : > { %2800 = dma.hbm_to_vmem [thread:$0]  (!%p3626_p6), %s4314_s16, 16, %s654_s30, [#allocation21]  }
 0x14c   : > { %s3303_s3 = scalar_lea.hbm %s4315_s17, 16 }
 0x14d   : > { %p3304_p13 = scmp.ne.s32.totalorder %s4315_s17, %s3303_s3  ;;  %p3310_p3 = scmp.lt.u32.totalorder %s3303_s3, %s4315_s17 }
 0x14f   : > { %p3306_p0 = pnand %p3304_p13, %p3640_p8 }
 0x151   : > { %p3307_p1 = pneg %p3306_p0 }
 0x153   : > { %p3312_p2 = pnand %p3310_p3, %p3307_p1 }
 0x155   : > { %3315 = shalt.err (!%p3312_p2)
}
 0x156   : > { %s3316_s25 = scalar_lea.vmem %s665_s20, 16  ;;  %s3323_s30 = scalar_lea.vmem %s665_s20, 32 }
 0x157   : > { %p3317_p5 = scmp.ne.s32.totalorder %s665_s20, %s3316_s25  ;;  %p3324_p10 = scmp.lt.s32.totalorder %s665_s20, %s665_s20 }
 0x158   : > { %p3325_p11 = scmp.lt.s32.totalorder %s3323_s30, %s3316_s25 }
 0x159   : > { %p3319_p7 = pnand %p3317_p5, %p3640_p8 }
 0x15a   : > { %p3326_p12 = por %p3325_p11, %p3324_p10 }
 0x15b   : > { %p3320_p9 = pneg %p3319_p7 }
 0x15d   : > { %p3327_p4 = pnand %p3326_p12, %p3320_p9 }
 0x15f   : > { %3330 = shalt.err (!%p3327_p4)
}
 0x160   : > { %s4361_s27 = sld [smem:[#allocation35_spill]]  ;;  %s4362_s0 = sld [smem:[#allocation36_spill]] }
 0x161   : > { %2803 = dma.hbm_to_vmem [thread:$0]  (!%p3626_p6), %s4315_s17, 16, %s665_s20, [#allocation24]  }
 0x162   : > { %s2397_s2 = sadd.s32 4294967294, %s3455_s24   ;;  %s3899_s4 = sadd.s32 1, %s3455_s24  }
 0x163   : > { %s76_s6 = sadd.s32 1, %s3451_s23  ;;  %s73_s29 = ssub.s32 %s3455_s24, %s3899_s4 }
 0x164   : > { %p83_p8 = scmp.ne.s32.totalorder %s3451_s23, %s3447_s22  ;;  %p74_p13 = scmp.eq.s32.totalorder %s73_s29, 0 }
 0x165   : > { %p84_p0 = scmp.eq.s32.totalorder %s3455_s24, 0  ;;  %p497_p9 = scmp.eq.s32.totalorder %s2397_s2, 1 }
 0x166   : > { %p89_p1 = scmp.ne.s32.totalorder %s3447_s22, %s4361_s27  ;;  %p491_p3 = scmp.eq.s32.totalorder %s4362_s0, 1 }
 0x167   : > { %s3911_s21 = scalar_select %p74_p13, %s3451_s23, %s76_s6  }
 0x168   : > { %p85_p2 = por %p84_p0, %p83_p8  ;;  %p4363_p5 = scmp.eq.s32.totalorder %s4362_s0, 0 }
 0x169   : > { %p3919_p6 = por %p491_p3, %p83_p8  ;;  %p2825_p10 = scmp.lt.s32.totalorder %s3455_s24, 2 }
 0x16a   : > { %p3915_p7 = por %p4363_p5, %p89_p1  ;;  %s689_s14 = sand.u32 1, %s3451_s23  }
 0x16b   : > { %s4365_s20 = scalar_select %p3919_p6, 1, 0 }
 0x16c   : > { %p3925_p11 = por %p497_p9, %p89_p1  ;;  %s2413_s18 = sshll.u32 %s3455_s24, 4 }
 0x16d   : > { %s4367_s30 = sld [smem:[#allocation39_spill]]  ;;  %s692_s26 = scalar_lea.vmem [#allocation2], %s689_s14 }
 0x16e   : > { %s4366_s1 = scalar_select %p3925_p11, 1, 0 }
 0x16f   : > { %s699_s27 = sshll.u32 %s692_s26, 4  ;;  %p3937_p12 = pnand %p2825_p10, %p85_p2  ;;  %s3935_s27 = int_to_ptr.vmem [resolvable:$true] %s699_s27 }
 0x170   : > { %s690_s2 = scalar_lea.sflag [#allocation3], %s689_s14 }
 0x171   : > { %p3333_p8 = pneg %p3937_p12 }
 0x173   : > { %s3933_s28 = scalar_lea.hbm %s4367_s30, %s2413_s18  ;;  %s3336_s19 = scalar_lea.hbm %s4367_s30, 32 }
 0x174   : > { %s3331_s6 = scalar_lea.hbm %s3933_s28, 16  ;;  %p3337_p1 = scmp.lt.u32.totalorder %s3933_s28, %s4367_s30 }
 0x175   : > { %p3332_p4 = scmp.ne.s32.totalorder %s3933_s28, %s3331_s6  ;;  %p3338_p3 = scmp.lt.u32.totalorder %s3336_s19, %s3331_s6 }
 0x176   : > { %p3340_p5 = scmp.lt.u32.totalorder %s3331_s6, %s3933_s28 }
 0x177   : > { %p3334_p13 = pnand %p3333_p8, %p3332_p4  ;;  %p3339_p2 = por %p3338_p3, %p3337_p1 }
 0x179   : > { %p3335_p0 = pneg %p3334_p13  ;;  %p3341_p9 = por %p3340_p5, %p3339_p2 }
 0x17b   : > { %p3342_p10 = pnand %p3341_p9, %p3335_p0 }
 0x17d   : > { %3345 = shalt.err (!%p3342_p10)
}
 0x17e   : > { %s3346_s14 = scalar_lea.vmem %s3935_s27, 16  ;;  %s3472_s29 = smov [#allocation2]  }
 0x17f   : > { %p3347_p4 = scmp.ne.s32.totalorder %s3935_s27, %s3346_s14  ;;  %s3351_s18 = sshll.u32 %s3472_s29, 4  ;;  %s3352_s18 = int_to_ptr.vmem [resolvable:$false] %s3351_s18 }
 0x180   : > { %s3353_s25 = scalar_lea.vmem %s3352_s18, 32  ;;  %p3354_p6 = scmp.lt.s32.totalorder %s3935_s27, %s3352_s18 }
 0x181   : > { %p3349_p13 = pnand %p3347_p4, %p3333_p8  ;;  %p3355_p1 = scmp.lt.s32.totalorder %s3353_s25, %s3346_s14 }
 0x183   : > { %p3350_p11 = pneg %p3349_p13  ;;  %p3356_p3 = por %p3355_p1, %p3354_p6 }
 0x185   : > { %p3357_p2 = pnand %p3356_p3, %p3350_p11 }
 0x187   : > { %3360 = shalt.err (!%p3357_p2)
}
 0x188   : > { %2807 = dma.hbm_to_vmem [thread:$0]  (!%p3937_p12), %s3933_s28, 16, %s3935_s27, %s690_s2  }
 0x189   : > { %s4369_s6 = sld [smem:[#allocation37_spill]] }
 0x18f   : > { %p4370_p0 = scmp.ne.s32.totalorder %s4369_s6, 0 }
 0x190   : > { %s3969_s19 = sand.u32 (!%p4370_p0), 1, %s3447_s22  }
 0x191   : > { %708 = sbr.rel (%p4370_p0) target bundleno = 4372 (0x1114), region = 100  ;;  %s711_s26 = scalar_lea.sflag (!%p4370_p0), [#allocation3], %s3969_s19 }
 0x198   : > { %3406 = dma.done.wait (%p3915_p7), %s711_s26, 16  }
 0x199   : > { %3408 = vsyncadd (%p3915_p7), %s711_s26, 4294967280  ;;  %s4371_s0 = sld [smem:[#allocation36_spill]] }
 0x19f   : > { %p4372_p6 = scmp.eq.s32.totalorder %s4371_s0, 0 }
 0x1a1   : > { %3410 = dma.done.wait (%p4372_p6), [#allocation6], 32   ;;  %p4373_p11 = pmov %p4372_p6 }
 0x1a2   : > { %p4374_p12 = pmov %p4372_p6 }
 0x1a3   : > { %3412 = vsyncadd (%p4373_p11), [#allocation6], 4294967264 }
 0x1a4   : > { %3414 = dma.done.wait (%p4374_p12), [#allocation9], 528   ;;  %p4375_p8 = pmov %p4372_p6 }
 0x1a5   : > { %p4376_p5 = pmov %p4372_p6 }
 0x1a6   : > { %3416 = vsyncadd (%p4375_p8), [#allocation9], 4294966768 }
 0x1a7   : > { %3418 = dma.done.wait (%p4376_p5), [#allocation12], 528   ;;  %p4377_p9 = pmov %p4376_p5 }
 0x1a8   : > { %p4378_p7 = pmov %p4376_p5 }
 0x1a9   : > { %3420 = vsyncadd (%p4377_p9), [#allocation12], 4294966768 }
 0x1aa   : > { %3422 = dma.done.wait (%p4378_p7), [#allocation15], 32   ;;  %p4379_p10 = pmov %p4376_p5 }
 0x1ab   : > { %p4380_p4 = pmov %p4376_p5 }
 0x1ac   : > { %3424 = vsyncadd (%p4379_p10), [#allocation15], 4294967264 }
 0x1ad   : > { %3426 = dma.done.wait (%p4380_p4), [#allocation18], 528   ;;  %p4381_p13 = pmov %p4380_p4 }
 0x1ae   : > { %p4382_p1 = pmov %p4380_p4 }
 0x1af   : > { %3428 = vsyncadd (%p4381_p13), [#allocation18], 4294966768 }
 0x1b0   : > { %3430 = dma.done.wait (%p4382_p1), [#allocation21], 32   ;;  %p4383_p3 = pmov %p4382_p1 }
 0x1b1   : > { %p4384_p2 = pmov %p4382_p1 }
 0x1b2   : > { %3432 = vsyncadd (%p4383_p3), [#allocation21], 4294967264 }
 0x1b3   : > { %3434 = dma.done.wait (%p4384_p2), [#allocation24], 16   ;;  %p4385_p0 = pmov %p4382_p1 }
 0x1b4   : > { %v3473_v0 = vmov 0.0   ;;  %p826_p6 = scmp.lt.s32.totalorder %s4371_s0, 1  ;;  %vm3474_vm0 = vmmov 0   ;;  %s4386_s2 = sld [smem:[#allocation42_spill]]  ;;  %vm877_vm1 = vcmask 523264   ;;  %v2903_v12 = vld [vmem:[#allocation8] sm:$0xff]   ;;  %v1088_v46 = vlaneseq }
 0x1b5   : > { %3436 = vsyncadd (%p4385_p0), [#allocation24], 4294967280  ;;  %2568 = vmatprep.subr.bf16.mxu1 %v3473_v0  ;;  %2556 = vmatprep.subr.bf16.mxu0 %v3473_v0  ;;  %s4387_s25 = sld [smem:[#allocation40_spill]]  ;;  %s4388_s8 = sld [smem:[#allocation38_spill]]  ;;  %v2904_v13 = vld [vmem:[#allocation8 + $0x8] sm:$0xff]   ;;  %v2905_v14 = vld [vmem:[#allocation8 + $0x10] sm:$0xff]  }
 0x1b6   : > { %2576 = vmatprep.mubr.msk.bf16.mxu1 %vm3474_vm0, %v3473_v0  ;;  %2564 = vmatprep.mubr.msk.bf16.mxu0 %vm3474_vm0, %v3473_v0  ;;  %s827_s3 = scalar_select %p826_p6, %s4371_s0, 1  ;;  %v2906_v15 = vld [vmem:[#allocation8 + $0x18] sm:$0xff]   ;;  %vm1093_vm2 = vcmask 130048   ;;  %v2443_v35 = vld [vmem:[#allocation10] ss:$0 sm:$0xff]  ;;  %v1089_v48 = vshrl.u32 %v1088_v46, 7 }
 0x1b7   : > { %v2431_v16 = vld [vmem:[#allocation5] ss:$0 sm:$0xff]  ;;  %v2437_v17 = vld [vmem:[#allocation7] ss:$0 sm:$0xff]  ;;  %s4389_s26 = scalar_lea.vmem [#allocation2], %s3969_s19  ;;  %s3477_s28 = smov 96  }
 0x1b8   : > { %s2496_s29 = sshll.u32 %s827_s3, 4  ;;  %v834_v47 = vld [vmem:[%s4389_s26] sm:$0x1]  ;;  %v1090_v49 = vsub.s32 0, %v1089_v48  ;;  %v3476_v50 = vmov -1e+10  }
 0x1b9   : > { %vm835_vm3 = vcmp.gt.f32.partialorder %v834_v47, 0.0  ;;  %v2907_v46 = vld [vmem:[#allocation11] sm:$0xff]   ;;  %s3478_s27 = smov 80   ;;  %s4390_s3 = sld [smem:[#allocation48_spill]] }
 0x1ba   : > { %v2895_v1 = vld [vmem:[%s4386_s2] sm:$0xff]   ;;  %v2897_v3 = vld [vmem:[%s4386_s2 + $0x8] sm:$0xff]   ;;  %v2899_v5 = vld [vmem:[%s4386_s2 + $0x10] sm:$0xff]   ;;  %v836_v51 = vsel %vm835_vm3, 0.0, %v3476_v50  ;;  %s2428_s5 = sshll.u32 %s3969_s19, 4  ;;  %s4392_s9 = sld [smem:[#allocation50_spill]] }
 0x1bb   : > { %v2896_v2 = vld [vmem:[%s4387_s25] sm:$0xff]   ;;  %2569 = vmatpush3.bf16.msra.mxu1 %v2895_v1  ;;  %v2898_v4 = vld [vmem:[%s4387_s25 + $0x8] sm:$0xff]   ;;  %s830_s14 = scalar_lea.vmem %s4388_s8, %s2496_s29  ;;  %v2900_v6 = vld [vmem:[%s4387_s25 + $0x10] sm:$0xff]   ;;  %s3475_s29 = smov 112   ;;  %v4093_v52 = vrot.slane %v836_v51, %v1090_v49 }
 0x1bc   : > { %2570 = vmatprep.subr.bf16.mxu1 %v3473_v0  ;;  %2557 = vmatpush3.bf16.msra.mxu0 %v2896_v2  ;;  %v2901_v7 = vld [vmem:[%s4386_s2 + $0x18] sm:$0xff]   ;;  %v4041_v8 = vld [vmem:[%s830_s14] sm:$0xff]  ;;  %v4043_v9 = vld [vmem:[%s830_s14 + $0x8] sm:$0xff]  ;;  %s825_s26 = scalar_lea.vmem [#allocation25], %s2428_s5  ;;  %s4393_s6 = sld [smem:[#allocation51_spill]] }
 0x1bd   : > { %2558 = vmatprep.subr.bf16.mxu0 %v3473_v0  ;;  %v2902_v10 = vld [vmem:[%s4387_s25 + $0x18] sm:$0xff]   ;;  %v837_v11 = vpack.c.bf16 %v4043_v9, %v4041_v8  ;;  %s2178_s5 = scalar_lea.sflag [#allocation4], %s3969_s19  ;;  %p4394_p12 = scmp.ne.s32.totalorder %s4365_s20, 0 }
 0x1be   : > { %s3479_s7 = smov [#allocation25]  }
 0x1bf   : > { %2571 = vmatpush3.bf16.msra.mxu1 %v2897_v3  ;;  %s3365_s8 = sshll.u32 %s3479_s7, 4  ;;  %s3366_s8 = int_to_ptr.vmem [resolvable:$false] %s3365_s8 }
 0x1c0   : > { %2572 = vmatprep.subr.bf16.mxu1 %v3473_v0  ;;  %2559 = vmatpush3.bf16.msra.mxu0 %v2898_v4 }
 0x1c1   : > { %2560 = vmatprep.subr.bf16.mxu0 %v3473_v0 }
 0x1c3   : > { %2573 = vmatpush3.bf16.msra.mxu1 %v2899_v5 }
 0x1c4   : > { %2574 = vmatprep.subr.bf16.mxu1 %v3473_v0  ;;  %2561 = vmatpush3.bf16.msra.mxu0 %v2900_v6 }
 0x1c5   : > { %2562 = vmatprep.subr.bf16.mxu0 %v3473_v0 }
 0x1c7   : > { %2575 = vmatpush3.bf16.msra.mxu1 %v2901_v7 }
 0x1c8   : > { %2563 = vmatpush3.bf16.msra.mxu0 %v2902_v10  ;;  %2592 = vmatprep.subr.bf16.mxu1 %v3473_v0 }
 0x1c9   : > { %2580 = vmatprep.subr.bf16.mxu0 %v3473_v0 }
 0x1ca   : > { %2577 = vmatmul.mubr.msk.bf16.vlgmr.msra.gmra.mrb[0].mxu1 %vm877_vm1, %v837_v11 }
 0x1cb   : > { %2565 = vmatmul.mubr.msk.bf16.vlgmr.msra.gmra.mrb[0].mxu0 %vm877_vm1, %v837_v11  ;;  %2594 = vmatprep.mubr.msk.bf16.mxu1 %vm3474_vm0, %v3473_v0 }
 0x1cc   : > { %2588 = vmatprep.mubr.msk.bf16.mxu0 %vm3474_vm0, %v3473_v0  ;;  %2581 = vmatpush3.bf16.msra.mxu0 %v2903_v12 }
 0x1cd   : > { %2582 = vmatprep.subr.bf16.mxu0 %v3473_v0 }
 0x1d0   : > { %2583 = vmatpush3.bf16.msra.mxu0 %v2904_v13 }
 0x1d1   : > { %2584 = vmatprep.subr.bf16.mxu0 %v3473_v0 }
 0x1d4   : > { %2585 = vmatpush3.bf16.msra.mxu0 %v2905_v14 }
 0x1d5   : > { %2586 = vmatprep.subr.bf16.mxu0 %v3473_v0 }
 0x1d8   : > { %2587 = vmatpush3.bf16.msra.mxu0 %v2906_v15 }
 0x1d9   : > { %2604 = vmatprep.subr.bf16.mxu0 %v3473_v0 }
 0x1db   : > { %2589 = vmatmul.mubr.msk.bf16.vlgmr.msra.gmra.mrb[4].mxu0 %vm877_vm1, %v837_v11 }
 0x1dc   : > { %2606 = vmatprep.mubr.msk.bf16.mxu0 %vm3474_vm0, %v3473_v0 }
 0x29d   : > { %v995_v18 = vpop.f32.mrb[0].mxu1 }
 0x29e   : > { %v2578_v19 = vpop.f32.mrb[1].mxu1  ;;  %v915_v20 = vpop.f32.mrb[0].mxu0  ;;  %v996_v24 = vadd.f32 %v2437_v17, %v995_v18 }
 0x29f   : > { %v998_v21 = vpop.f32.mrb[2].mxu1  ;;  %v916_v22 = vadd.f32 %v2431_v16, %v915_v20  ;;  %v2566_v23 = vpop.f32.mrb[1].mxu0 }
 0x2a0   : > { %v999_v25 = vadd.f32 %v2437_v17, %v998_v21  ;;  %v2579_v26 = vpop.f32.mrb[3].mxu1  ;;  %v918_v27 = vpop.f32.mrb[2].mxu0 }
 0x2a1   : > { %v1082_v28 = vmul.f32 0.25, %v916_v22  ;;  %v919_v29 = vadd.f32 %v2431_v16, %v918_v27  ;;  %v2567_v30 = vpop.f32.mrb[3].mxu0 }
 0x2a2   : > { %v4067_v31 = vpack.c.bf16 %v999_v25, %v996_v24 }
 0x2a3   : > { %v1083_v32 = vmul.f32 0.25, %v919_v29 }
 0x2a4   : > { %1215 = vrot.lane.b32.xlu0 %v4067_v31, %s3475_s29  ;;  %v1098_v33 = vsel %vm1093_vm2, %v4067_v31, 0 }
 0x2a5   : > { %v4073_v34 = vpack.c.bf16 %v1083_v32, %v1082_v28  ;;  %2593 = vmatpush3.bf16.xpose.msra.mxu1 %v1098_v33 }
 0x2a6   : > { %2598 = vmatprep.subr.bf16.mxu1 %v3473_v0 }
 0x2a8   : > { %1212 = vrot.lane.b32.xlu0 %v4073_v34, %s3475_s29 }
 0x2ac   : > { %2595 = vmatmul.mubr.msk.bf16.vlgmr.msra.gmra.mrb[4].mxu1 %vm1093_vm2, %v4073_v34 }
 0x2ad   : > { %2600 = vmatprep.mubr.msk.bf16.mxu1 %vm3474_vm0, %v3473_v0 }
 0x2ae   : > { %v1075_v36 = vpop.f32.mrb[4].mxu0 }
 0x2af   : > { %v1076_v37 = vadd.f32 %v2443_v35, %v1075_v36  ;;  %v2590_v38 = vpop.f32.mrb[5].mxu0 }
 0x2b0   : > { %v1078_v39 = vpop.f32.mrb[6].mxu0 }
 0x2b1   : > { %v1079_v40 = vadd.f32 %v2443_v35, %v1078_v39  ;;  %v2591_v41 = vpop.f32.mrb[7].mxu0 }
 0x2b3   : > { %v4082_v42 = vpack.c.bf16 %v1079_v40, %v1076_v37  ;;  %v2908_v37 = vld [vmem:[#allocation11 + $0x8] sm:$0xff]  }
 0x2b5   : > { %2599 = vmatpush3.bf16.msra.mxu1 %v4082_v42 }
 0x2b6   : > { %2610 = vmatprep.subr.bf16.mxu1 %v3473_v0 }
 0x316   : > { %v1216_v43 = vpop.permute.xlu0 %1215 }
 0x317   : > { %v1221_v44 = vsel %vm1093_vm2, %v1216_v43, 0 }
 0x318   : > { %2605 = vmatpush3.bf16.xpose.msra.mxu0 %v1221_v44 }
 0x319   : > { %2616 = vmatprep.subr.bf16.mxu0 %v3473_v0 }
 0x31a   : > { %v1213_v45 = vpop.permute.xlu0 %1212 }
 0x31f   : > { %2607 = vmatmul.mubr.msk.bf16.vlgmr.msra.gmra.mrb[8].mxu0 %vm1093_vm2, %v1213_v45 }
 0x320   : > { %2618 = vmatprep.mubr.msk.bf16.mxu0 %vm3474_vm0, %v3473_v0  ;;  %2617 = vmatpush3.bf16.msra.mxu0 %v2908_v37 }
 0x321   : > { %2628 = vmatprep.subr.bf16.mxu0 %v3473_v0 }
 0x37f   : > { %v1134_v53 = vpop.f32.mrb[4].mxu1 }
 0x380   : > { %v1135_v54 = vadd.f32 %v1134_v53, %v4093_v52  ;;  %v2596_v55 = vpop.f32.mrb[5].mxu1 }
 0x381   : > { %v1137_v56 = vpop.f32.mrb[6].mxu1 }
 0x382   : > { %v1138_v57 = vadd.f32 %v1137_v56, %v4093_v52  ;;  %v2597_v58 = vpop.f32.mrb[7].mxu1  ;;  %v1141_v59 = vsel %vm1093_vm2, %v1135_v54, -inf }
 0x383   : > { %1142 = vmax.xlane.f32.xlu1 %v1141_v59 }
 0x384   : > { %v1144_v60 = vsel %vm1093_vm2, %v1138_v57, -inf }
 0x387   : > { %1145 = vmax.xlane.f32.xlu1 %v1144_v60 }
 0x3f2   : > { %v1257_v61 = vpop.f32.mrb[8].mxu0 }
 0x3f3   : > { %v1258_v62 = vadd.f32 %v1257_v61, %v4093_v52  ;;  %v2608_v63 = vpop.f32.mrb[9].mxu0 }
 0x3f4   : > { %v1260_v1 = vpop.f32.mrb[10].mxu0 }
 0x3f5   : > { %v1261_v2 = vadd.f32 %v1260_v1, %v4093_v52  ;;  %v2609_v3 = vpop.f32.mrb[11].mxu0  ;;  %v1264_v4 = vsel %vm1093_vm2, %v1258_v62, -inf }
 0x3f6   : > { %1265 = vmax.xlane.f32.xlu0 %v1264_v4 }
 0x3f7   : > { %v1267_v5 = vsel %vm1093_vm2, %v1261_v2, -inf }
 0x3f8   : > { %1268 = vmax.xlane.f32.xlu1 %v1267_v5 }
 0x40c   : > { %1440 = vrot.lane.b32.xlu0 %v4067_v31, %s3477_s28 }
 0x410   : > { %v1143_v6 = vpop.xlane.xlu1 %1142 }
 0x411   : > { %v1147_v7 = vsub.f32 %v1135_v54, %v1143_v6 }
 0x413   : > { %v1149_v10 = vmul.f32 1.442695, %v1147_v7 }
 0x414   : > { %v1146_v11 = vpop.xlane.xlu1 %1145 }
 0x415   : > { %2927 = vpow2.f32 %v1149_v10  ;;  %v1148_v12 = vsub.f32 %v1138_v57, %v1146_v11 }
 0x417   : > { %v1151_v13 = vmul.f32 1.442695, %v1148_v12 }
 0x419   : > { %2929 = vpow2.f32 %v1151_v13 }
 0x41f   : > { %v2928_v14 = vpop.eup %2927 }
 0x420   : > { %v1153_v15 = vsel %vm1093_vm2, %v2928_v14, 0.0 }
 0x421   : > { %1154 = vadd.xlane.f32.xlu1 %v1153_v15 }
 0x423   : > { %v2930_v16 = vpop.eup %2929 }
 0x424   : > { %v1156_v17 = vsel %vm1093_vm2, %v2930_v16, 0.0 }
 0x425   : > { %1157 = vadd.xlane.f32.xlu1 %v1156_v17 }
 0x483   : > { %v1266_v18 = vpop.xlane.xlu0 %1265 }
 0x484   : > { %v1270_v19 = vsub.f32 %v1258_v62, %v1266_v18 }
 0x485   : > { %v1269_v20 = vpop.xlane.xlu1 %1268 }
 0x486   : > { %v1272_v21 = vmul.f32 1.442695, %v1270_v19  ;;  %v1271_v22 = vsub.f32 %v1261_v2, %v1269_v20 }
 0x487   : > { %v1441_v56 = vpop.permute.xlu0 %1440 }
 0x488   : > { %2931 = vpow2.f32 %v1272_v21  ;;  %v1274_v23 = vmul.f32 1.442695, %v1271_v22  ;;  %v1446_v60 = vsel %vm1093_vm2, %v1441_v56, 0 }
 0x48a   : > { %2933 = vpow2.f32 %v1274_v23 }
 0x492   : > { %v2932_v24 = vpop.eup %2931 }
 0x493   : > { %v1276_v25 = vsel %vm1093_vm2, %v2932_v24, 0.0 }
 0x494   : > { %v2934_v26 = vpop.eup %2933  ;;  %1277 = vadd.xlane.f32.xlu1 %v1276_v25 }
 0x495   : > { %v1279_v27 = vsel %vm1093_vm2, %v2934_v26, 0.0 }
 0x498   : > { %1280 = vadd.xlane.f32.xlu1 %v1279_v27 }
 0x4a9   : > { %1288 = vrot.lane.b32.xlu1 %v4082_v42, %s3475_s29  ;;  %s4391_s29 = sld [smem:[#allocation49_spill]] }
 0x4ad   : > { %1438 = vrot.lane.b32.xlu1 %v4073_v34, %s3477_s28 }
 0x4ae   : > { %v1155_v28 = vpop.xlane.xlu1 %1154 }
 0x4af   : > { %2935 = vrcp.f32 %v1155_v28 }
 0x4b2   : > { %v1158_v29 = vpop.xlane.xlu1 %1157 }
 0x4b3   : > { %2937 = vrcp.f32 %v1158_v29 }
 0x4b9   : > { %v2936_v30 = vpop.eup %2935 }
 0x4ba   : > { %v1161_v33 = vmul.f32 %v2936_v30, %v2928_v14 }
 0x4bd   : > { %v2938_v32 = vpop.eup %2937 }
 0x4be   : > { %v1162_v35 = vmul.f32 %v2938_v32, %v2930_v16 }
 0x4c0   : > { %v1163_v36 = vpack.c.bf16 %v1162_v35, %v1161_v33 }
 0x4c2   : > { %2601 = vmatmul.mubr.msk.bf16.vlgmr.msra.gmra.mrb[8].mxu1 %vm1093_vm2, %v1163_v36 }
 0x4c3   : > { %2612 = vmatprep.mubr.msk.bf16.mxu1 %vm3474_vm0, %v3473_v0 }
 0x521   : > { %v1278_v38 = vpop.xlane.xlu1 %1277 }
 0x522   : > { %2939 = vrcp.f32 %v1278_v38 }
 0x525   : > { %v1281_v39 = vpop.xlane.xlu1 %1280 }
 0x526   : > { %2941 = vrcp.f32 %v1281_v39 }
 0x529   : > { %v1289_v40 = vpop.permute.xlu1 %1288 }
 0x52a   : > { %2611 = vmatpush3.bf16.msra.mxu1 %v1289_v40 }
 0x52b   : > { %2622 = vmatprep.subr.bf16.mxu1 %v3473_v0 }
 0x52c   : > { %v2940_v41 = vpop.eup %2939 }
 0x52d   : > { %v1284_v44 = vmul.f32 %v2940_v41, %v2932_v24  ;;  %v1439_v61 = vpop.permute.xlu1 %1438 }
 0x530   : > { %v2942_v43 = vpop.eup %2941 }
 0x531   : > { %v1285_v45 = vmul.f32 %v2942_v43, %v2934_v26 }
 0x533   : > { %v1286_v47 = vpack.c.bf16 %v1285_v45, %v1284_v44 }
 0x535   : > { %2613 = vmatmul.mubr.msk.bf16.vlgmr.msra.gmra.mrb[12].mxu1 %vm1093_vm2, %v1286_v47 }
 0x536   : > { %2623 = vmatpush3.bf16.msra.mxu1 %v2907_v46  ;;  %2624 = vmatprep.mubr.msk.bf16.mxu1 %vm3474_vm0, %v3473_v0 }
 0x537   : > { %2634 = vmatprep.subr.bf16.mxu1 %v3473_v0 }
 0x595   : > { %v1201_v48 = vpop.f32.mrb[8].mxu1 }
 0x596   : > { %v2602_v49 = vpop.f32.mrb[9].mxu1 }
 0x597   : > { %v1204_v50 = vpop.f32.mrb[10].mxu1 }
 0x598   : > { %v1208_v51 = vpack.c.bf16 %v1204_v50, %v1201_v48  ;;  %v2603_v53 = vpop.f32.mrb[11].mxu1 }
 0x59a   : > { %2625 = vmatmul.mubr.msk.bf16.vlgmr.msra.gmra.mrb[16].mxu1 %vm1093_vm2, %v1208_v51 }
 0x59b   : > { %2636 = vmatprep.mubr.msk.bf16.mxu1 %vm3474_vm0, %v3473_v0 }
 0x608   : > { %v1328_v54 = vpop.f32.mrb[12].mxu1 }
 0x609   : > { %v2614_v55 = vpop.f32.mrb[13].mxu1 }
 0x60a   : > { %v1331_v57 = vpop.f32.mrb[14].mxu1 }
 0x60b   : > { %v1335_v58 = vpack.c.bf16 %v1331_v57, %v1328_v54  ;;  %v2615_v59 = vpop.f32.mrb[15].mxu1 }
 0x60d   : > { %2619 = vmatmul.mubr.msk.bf16.vlgmr.msra.gmra.mrb[12].mxu0 %vm1093_vm2, %v1335_v58 }
 0x60e   : > { %2629 = vmatpush3.bf16.xpose.msra.mxu0 %v1446_v60  ;;  %2630 = vmatprep.mubr.msk.bf16.mxu0 %vm3474_vm0, %v3473_v0 }
 0x60f   : > { %2640 = vmatprep.subr.bf16.mxu0 %v3473_v0 }
 0x615   : > { %2631 = vmatmul.mubr.msk.bf16.vlgmr.msra.gmra.mrb[16].mxu0 %vm1093_vm2, %v1439_v61 }
 0x616   : > { %2642 = vmatprep.mubr.msk.bf16.mxu0 %vm3474_vm0, %v3473_v0 }
 0x66d   : > { %v1431_v62 = vpop.f32.mrb[16].mxu1 }
 0x66e   : > { %v2626_v63 = vpop.f32.mrb[17].mxu1 }
 0x66f   : > { %v1434_v1 = vpop.f32.mrb[18].mxu1 }
 0x670   : > { %v2627_v2 = vpop.f32.mrb[19].mxu1 }
 0x6e0   : > { %v1381_v3 = vpop.f32.mrb[12].mxu0 }
 0x6e1   : > { %v4133_v4 = vadd.f32 %v1431_v62, %v1381_v3  ;;  %v2620_v5 = vpop.f32.mrb[13].mxu0 }
 0x6e2   : > { %v1384_v6 = vpop.f32.mrb[14].mxu0 }
 0x6e3   : > { %v4135_v7 = vadd.f32 %v1434_v1, %v1384_v6  ;;  %v2621_v10 = vpop.f32.mrb[15].mxu0 }
 0x6e8   : > { %v1482_v11 = vpop.f32.mrb[16].mxu0 }
 0x6e9   : > { %v1483_v12 = vadd.f32 %v1482_v11, %v4093_v52  ;;  %v2632_v13 = vpop.f32.mrb[17].mxu0 }
 0x6ea   : > { %v1485_v14 = vpop.f32.mrb[18].mxu0 }
 0x6eb   : > { %v1486_v15 = vadd.f32 %v1485_v14, %v4093_v52  ;;  %v2633_v16 = vpop.f32.mrb[19].mxu0  ;;  %v1489_v17 = vsel %vm1093_vm2, %v1483_v12, -inf }
 0x6ec   : > { %1490 = vmax.xlane.f32.xlu1 %v1489_v17 }
 0x6ed   : > { %v1492_v18 = vsel %vm1093_vm2, %v1486_v15, -inf }
 0x6ee   : > { %1493 = vmax.xlane.f32.xlu0 %v1492_v18 }
 0x704   : > { %1512 = vrot.lane.b32.xlu0 %v4082_v42, %s3477_s28  ;;  %s2191_s28 = sshll.u32 %s825_s26, 4  ;;  %s4249_s28 = int_to_ptr.vmem [resolvable:$true] %s2191_s28 }
 0x705   : > { %p3368_p9 = scmp.lt.s32.totalorder %s4249_s28, %s3366_s8 }
 0x779   : > { %v1491_v19 = vpop.xlane.xlu1 %1490 }
 0x77a   : > { %v1495_v20 = vsub.f32 %v1483_v12, %v1491_v19 }
 0x77b   : > { %v1494_v21 = vpop.xlane.xlu0 %1493 }
 0x77c   : > { %v1497_v22 = vmul.f32 1.442695, %v1495_v20  ;;  %v1496_v23 = vsub.f32 %v1486_v15, %v1494_v21 }
 0x77e   : > { %2943 = vpow2.f32 %v1497_v22  ;;  %v1499_v24 = vmul.f32 1.442695, %v1496_v23 }
 0x77f   : > { %v1513_v25 = vpop.permute.xlu0 %1512 }
 0x780   : > { %2945 = vpow2.f32 %v1499_v24  ;;  %2635 = vmatpush3.bf16.msra.mxu1 %v1513_v25  ;;  %v2465_v24 = vld [vmem:[#allocation13] ss:$0 sm:$0xff] }
 0x781   : > { %2646 = vmatprep.subr.bf16.mxu1 %v3473_v0 }
 0x788   : > { %v2944_v26 = vpop.eup %2943 }
 0x789   : > { %v1501_v27 = vsel %vm1093_vm2, %v2944_v26, 0.0 }
 0x78a   : > { %v2946_v28 = vpop.eup %2945  ;;  %1502 = vadd.xlane.f32.xlu1 %v1501_v27 }
 0x78b   : > { %v1504_v29 = vsel %vm1093_vm2, %v2946_v28, 0.0 }
 0x78e   : > { %1505 = vadd.xlane.f32.xlu1 %v1504_v29 }
 0x79f   : > { %1616 = vrot.lane.b32.xlu1 %v4067_v31, %s3478_s27 }
 0x7a3   : > { %1614 = vrot.lane.b32.xlu1 %v4073_v34, %s3478_s27  ;;  %v2909_v34 = vld [vmem:[#allocation11 + $0x10] sm:$0xff]  }
 0x7a4   : > { %2641 = vmatpush3.bf16.msra.mxu0 %v2909_v34 }
 0x7a5   : > { %2652 = vmatprep.subr.bf16.mxu0 %v3473_v0 }
 0x817   : > { %v1503_v30 = vpop.xlane.xlu1 %1502 }
 0x818   : > { %2947 = vrcp.f32 %v1503_v30 }
 0x81b   : > { %v1506_v32 = vpop.xlane.xlu1 %1505 }
 0x81c   : > { %2949 = vrcp.f32 %v1506_v32 }
 0x81f   : > { %v1617_v38 = vpop.permute.xlu1 %1616 }
 0x820   : > { %v1622_v40 = vsel %vm1093_vm2, %v1617_v38, 0 }
 0x822   : > { %v2948_v33 = vpop.eup %2947 }
 0x823   : > { %v1509_v36 = vmul.f32 %v2948_v33, %v2944_v26  ;;  %v1615_v31 = vpop.permute.xlu1 %1614 }
 0x826   : > { %v2950_v35 = vpop.eup %2949 }
 0x827   : > { %v1510_v37 = vmul.f32 %v2950_v35, %v2946_v28 }
 0x829   : > { %v1511_v39 = vpack.c.bf16 %v1510_v37, %v1509_v36 }
 0x82b   : > { %2637 = vmatmul.mubr.msk.bf16.vlgmr.msra.gmra.mrb[20].mxu1 %vm1093_vm2, %v1511_v39 }
 0x82c   : > { %2647 = vmatpush3.bf16.xpose.msra.mxu1 %v1622_v40  ;;  %2648 = vmatprep.mubr.msk.bf16.mxu1 %vm3474_vm0, %v3473_v0 }
 0x82d   : > { %2658 = vmatprep.subr.bf16.mxu1 %v3473_v0 }
 0x833   : > { %2649 = vmatmul.mubr.msk.bf16.vlgmr.msra.gmra.mrb[24].mxu1 %vm1093_vm2, %v1615_v31 }
 0x834   : > { %2660 = vmatprep.mubr.msk.bf16.mxu1 %vm3474_vm0, %v3473_v0 }
 0x8fe   : > { %v1552_v41 = vpop.f32.mrb[20].mxu1 }
 0x8ff   : > { %v2638_v43 = vpop.f32.mrb[21].mxu1 }
 0x900   : > { %v1555_v44 = vpop.f32.mrb[22].mxu1 }
 0x901   : > { %v1559_v45 = vpack.c.bf16 %v1555_v44, %v1552_v41  ;;  %v2639_v46 = vpop.f32.mrb[23].mxu1 }
 0x902   : > { %v2911_v46 = vld [vmem:[#allocation17] sm:$0xff]  }
 0x903   : > { %2643 = vmatmul.mubr.msk.bf16.vlgmr.msra.gmra.mrb[20].mxu0 %vm1093_vm2, %v1559_v45 }
 0x904   : > { %2654 = vmatprep.mubr.msk.bf16.mxu0 %vm3474_vm0, %v3473_v0 }
 0x906   : > { %v1658_v47 = vpop.f32.mrb[24].mxu1 }
 0x907   : > { %v1659_v48 = vadd.f32 %v1658_v47, %v4093_v52  ;;  %v2650_v49 = vpop.f32.mrb[25].mxu1  ;;  %v2913_v47 = vld [vmem:[#allocation17 + $0x10] sm:$0xff]  }
 0x908   : > { %v1661_v50 = vpop.f32.mrb[26].mxu1  ;;  %v2915_v49 = vld [vmem:[%s4390_s3] sm:$0xff]  }
 0x909   : > { %v1662_v51 = vadd.f32 %v1661_v50, %v4093_v52  ;;  %v2651_v53 = vpop.f32.mrb[27].mxu1  ;;  %v1665_v54 = vsel %vm1093_vm2, %v1659_v48, -inf  ;;  %v2916_v50 = vld [vmem:[%s4390_s3 + $0x8] sm:$0xff]  }
 0x90a   : > { %1666 = vmax.xlane.f32.xlu0 %v1665_v54  ;;  %v2918_v53 = vld [vmem:[%s4390_s3 + $0x18] sm:$0xff]   ;;  %v2919_v54 = vld [vmem:[%s4390_s3 + $0x20] sm:$0xff]  }
 0x90b   : > { %v1668_v55 = vsel %vm1093_vm2, %v1662_v51, -inf }
 0x90c   : > { %1669 = vmax.xlane.f32.xlu1 %v1668_v55  ;;  %v2920_v55 = vld [vmem:[%s4390_s3 + $0x28] sm:$0xff]  }
 0x91d   : > { %1688 = vrot.lane.b32.xlu1 %v4082_v42, %s3478_s27  ;;  %v2910_v42 = vld [vmem:[#allocation11 + $0x18] sm:$0xff]   ;;  %s2497_s27 = sshll.u32 %s4371_s0, 8  ;;  %s3361_s0 = scalar_lea.vmem %s4249_s28, 256 }
 0x91e   : > { %2659 = vmatpush3.bf16.msra.mxu1 %v2910_v42  ;;  %s4254_s2 = scalar_lea.hbm %s4393_s6, %s2497_s27  ;;  %p3362_p11 = scmp.ne.s32.totalorder %s4249_s28, %s3361_s0 }
 0x91f   : > { %2676 = vmatprep.subr.bf16.mxu1 %v3473_v0 }
 0x920   : > { %p3363_p8 = pnand %p3362_p11, %p4394_p12 }
 0x922   : > { %p3364_p5 = pneg %p3363_p8 }
 0x997   : > { %v1667_v56 = vpop.xlane.xlu0 %1666 }
 0x998   : > { %v1671_v57 = vsub.f32 %v1659_v48, %v1667_v56  ;;  %v2914_v48 = vld [vmem:[#allocation17 + $0x18] sm:$0xff]  }
 0x999   : > { %v1670_v58 = vpop.xlane.xlu1 %1669 }
 0x99a   : > { %v1673_v59 = vmul.f32 1.442695, %v1671_v57  ;;  %v1672_v60 = vsub.f32 %v1662_v51, %v1670_v58  ;;  %v2917_v51 = vld [vmem:[%s4390_s3 + $0x10] sm:$0xff]  }
 0x99c   : > { %2951 = vpow2.f32 %v1673_v59  ;;  %v1675_v61 = vmul.f32 1.442695, %v1672_v60 }
 0x99d   : > { %v1689_v62 = vpop.permute.xlu1 %1688 }
 0x99e   : > { %2953 = vpow2.f32 %v1675_v61  ;;  %2653 = vmatpush3.bf16.msra.mxu0 %v1689_v62 }
 0x99f   : > { %2664 = vmatprep.subr.bf16.mxu0 %v3473_v0 }
 0x9a6   : > { %v2952_v52 = vpop.eup %2951 }
 0x9a7   : > { %v1677_v63 = vsel %vm1093_vm2, %v2952_v52, 0.0 }
 0x9a8   : > { %v2954_v1 = vpop.eup %2953  ;;  %1678 = vadd.xlane.f32.xlu0 %v1677_v63  ;;  %v2466_v63 = vld [vmem:[#allocation14] ss:$0 sm:$0xff] }
 0x9a9   : > { %v1680_v2 = vsel %vm1093_vm2, %v2954_v1, 0.0 }
 0x9ac   : > { %1681 = vadd.xlane.f32.xlu0 %v1680_v2 }
 0x9d6   : > { %v1605_v3 = vpop.f32.mrb[20].mxu0 }
 0x9d7   : > { %v1612_v5 = vadd.f32 %v1605_v3, %v4133_v4  ;;  %v2644_v6 = vpop.f32.mrb[21].mxu0  ;;  %v2467_v3 = vld [vmem:[#allocation16] ss:$0 sm:$0xff] }
 0x9d8   : > { %v1608_v10 = vpop.f32.mrb[22].mxu0 }
 0x9d9   : > { %v1613_v11 = vadd.f32 %v1608_v10, %v4135_v7  ;;  %v2645_v12 = vpop.f32.mrb[23].mxu0 }
 0x9da   : > { %v2921_v12 = vld [vmem:[%s4390_s3 + $0x30] sm:$0xff]  }
 0xa35   : > { %v1679_v13 = vpop.xlane.xlu0 %1678 }
 0xa36   : > { %2955 = vrcp.f32 %v1679_v13  ;;  %v2922_v13 = vld [vmem:[%s4390_s3 + $0x38] sm:$0xff]  }
 0xa39   : > { %v1682_v14 = vpop.xlane.xlu0 %1681 }
 0xa3a   : > { %2957 = vrcp.f32 %v1682_v14  ;;  %v2468_v14 = vld [vmem:[#allocation19] ss:$0 sm:$0xff] }
 0xa40   : > { %v2956_v15 = vpop.eup %2955 }
 0xa41   : > { %v1685_v17 = vmul.f32 %v2956_v15, %v2952_v52 }
 0xa44   : > { %v2958_v16 = vpop.eup %2957 }
 0xa45   : > { %v1686_v18 = vmul.f32 %v2958_v16, %v2954_v1 }
 0xa47   : > { %v1687_v19 = vpack.c.bf16 %v1686_v18, %v1685_v17 }
 0xa49   : > { %2655 = vmatmul.mubr.msk.bf16.vlgmr.msra.gmra.mrb[24].mxu0 %vm1093_vm2, %v1687_v19 }
 0xa4a   : > { %2672 = vmatprep.mubr.msk.bf16.mxu0 %vm3474_vm0, %v3473_v0  ;;  %2665 = vmatpush3.bf16.msra.mxu0 %v2911_v46  ;;  %v2926_v46 = vld [vmem:[%s4391_s29 + $0x18] sm:$0xff]  }
 0xa4b   : > { %2666 = vmatprep.subr.bf16.mxu0 %v3473_v0 }
 0xb1c   : > { %v1728_v4 = vpop.f32.mrb[24].mxu0 }
 0xb1d   : > { %v2656_v20 = vpop.f32.mrb[25].mxu0 }
 0xb1e   : > { %v1731_v21 = vpop.f32.mrb[26].mxu0 }
 0xb1f   : > { %v1735_v22 = vpack.c.bf16 %v1731_v21, %v1728_v4  ;;  %v2657_v7 = vpop.f32.mrb[27].mxu0 }
 0xb20   : > { %v2474_v7 = vld [vmem:[#allocation20] ss:$0 sm:$0xff] }
 0xb21   : > { %2661 = vmatmul.mubr.msk.bf16.vlgmr.msra.gmra.mrb[28].mxu1 %vm1093_vm2, %v1735_v22 }
 0xb22   : > { %2692 = vmatprep.mubr.msk.bf16.mxu1 %vm3474_vm0, %v3473_v0  ;;  %2677 = vmatpush3.bf16.msra.mxu1 %v2915_v49 }
 0xb23   : > { %2678 = vmatprep.subr.bf16.mxu1 %v3473_v0 }
 0xb26   : > { %2679 = vmatpush3.bf16.msra.mxu1 %v2916_v50 }
 0xb27   : > { %2680 = vmatprep.subr.bf16.mxu1 %v3473_v0 }
 0xb2a   : > { %2681 = vmatpush3.bf16.msra.mxu1 %v2917_v51 }
 0xb2b   : > { %2682 = vmatprep.subr.bf16.mxu1 %v3473_v0 }
 0xb2e   : > { %2683 = vmatpush3.bf16.msra.mxu1 %v2918_v53 }
 0xb2f   : > { %2684 = vmatprep.subr.bf16.mxu1 %v3473_v0 }
 0xb32   : > { %2685 = vmatpush3.bf16.msra.mxu1 %v2919_v54 }
 0xb33   : > { %2686 = vmatprep.subr.bf16.mxu1 %v3473_v0 }
 0xb36   : > { %2687 = vmatpush3.bf16.msra.mxu1 %v2920_v55  ;;  %v2483_v55 = vld [vmem:[#allocation22] ss:$0 sm:$0xff] }
 0xb37   : > { %2688 = vmatprep.subr.bf16.mxu1 %v3473_v0 }
 0xb3a   : > { %2689 = vmatpush3.bf16.msra.mxu1 %v2921_v12 }
 0xb3b   : > { %2690 = vmatprep.subr.bf16.mxu1 %v3473_v0 }
 0xb3e   : > { %2691 = vmatpush3.bf16.msra.mxu1 %v2922_v13 }
 0xbf4   : > { %v1781_v23 = vpop.f32.mrb[28].mxu1 }
 0xbf5   : > { %v1788_v25 = vadd.f32 %v1781_v23, %v1612_v5  ;;  %v2662_v26 = vpop.f32.mrb[29].mxu1 }
 0xbf6   : > { %v1784_v27 = vpop.f32.mrb[30].mxu1 }
 0xbf7   : > { %v1797_v28 = vadd.f32 %v2465_v24, %v1788_v25  ;;  %v1789_v29 = vadd.f32 %v1784_v27, %v1613_v11  ;;  %v2663_v30 = vpop.f32.mrb[31].mxu1 }
 0xbf9   : > { %v1798_v32 = vadd.f32 %v2465_v24, %v1789_v29  ;;  %v1799_v33 = vadd.f32 %v1797_v28, %v4041_v8 }
 0xbfb   : > { %v1801_v35 = vsel %vm877_vm1, %v1799_v33, 0.0  ;;  %v1800_v36 = vadd.f32 %v1798_v32, %v4043_v9  ;;  %v2912_v9 = vld [vmem:[#allocation17 + $0x8] sm:$0xff]  }
 0xbfc   : > { %1802 = vadd.xlane.f32.xlu0 %v1801_v35  ;;  %2667 = vmatpush3.bf16.msra.mxu0 %v2912_v9 }
 0xbfd   : > { %v1804_v37 = vsel %vm877_vm1, %v1800_v36, 0.0  ;;  %2668 = vmatprep.subr.bf16.mxu0 %v3473_v0 }
 0xc00   : > { %1805 = vadd.xlane.f32.xlu0 %v1804_v37  ;;  %2669 = vmatpush3.bf16.msra.mxu0 %v2913_v47 }
 0xc01   : > { %2670 = vmatprep.subr.bf16.mxu0 %v3473_v0 }
 0xc04   : > { %2671 = vmatpush3.bf16.msra.mxu0 %v2914_v48 }
 0xc05   : > { %2696 = vmatprep.subr.bf16.mxu0 %v3473_v0 }
 0xc89   : > { %v1803_v38 = vpop.xlane.xlu0 %1802 }
 0xc8a   : > { %v1808_v39 = vmul.f32 0.015625, %v1803_v38 }
 0xc8c   : > { %v1810_v40 = vsub.f32 %v1799_v33, %v1808_v39 }
 0xc8d   : > { %v1806_v31 = vpop.xlane.xlu0 %1805 }
 0xc8e   : > { %v1809_v34 = vmul.f32 0.015625, %v1806_v31  ;;  %v1812_v41 = vmul.f32 %v1810_v40, %v1810_v40 }
 0xc90   : > { %v1811_v43 = vsub.f32 %v1800_v36, %v1809_v34  ;;  %v1814_v44 = vsel %vm877_vm1, %v1812_v41, 0.0 }
 0xc91   : > { %1815 = vadd.xlane.f32.xlu0 %v1814_v44  ;;  %v2923_v44 = vld [vmem:[%s4391_s29] sm:$0xff]  }
 0xc92   : > { %v1813_v45 = vmul.f32 %v1811_v43, %v1811_v43 }
 0xc94   : > { %v1817_v8 = vsel %vm877_vm1, %v1813_v45, 0.0  ;;  %v2924_v45 = vld [vmem:[%s4391_s29 + $0x8] sm:$0xff]  }
 0xc95   : > { %1818 = vadd.xlane.f32.xlu0 %v1817_v8  ;;  %v2925_v8 = vld [vmem:[%s4391_s29 + $0x10] sm:$0xff]  }
 0xd1e   : > { %v1816_v56 = vpop.xlane.xlu0 %1815 }
 0xd1f   : > { %v1820_v57 = vmul.f32 0.015625, %v1816_v56 }
 0xd21   : > { %v1822_v58 = vadd.f32 1e-05, %v1820_v57 }
 0xd22   : > { %v1819_v59 = vpop.xlane.xlu0 %1818 }
 0xd23   : > { %2959 = vrsqrt.f32 %v1822_v58  ;;  %v1821_v60 = vmul.f32 0.015625, %v1819_v59  ;;  %v2484_v59 = vld [vmem:[#allocation23] ss:$0 sm:$0xff] }
 0xd25   : > { %v1823_v61 = vadd.f32 1e-05, %v1821_v60 }
 0xd27   : > { %2961 = vrsqrt.f32 %v1823_v61 }
 0xd2d   : > { %v2960_v62 = vpop.eup %2959 }
 0xd2e   : > { %v1826_v52 = vmul.f32 %v2960_v62, %v1810_v40 }
 0xd30   : > { %v1835_v2 = vmul.f32 %v2466_v63, %v1826_v52  ;;  %v2485_v52 = vld [vmem:[%s4392_s9] ss:$0 sm:$0xff]  ;;  %s3367_s9 = scalar_lea.vmem %s3366_s8, 512 }
 0xd31   : > { %v2962_v1 = vpop.eup %2961  ;;  %p3369_p7 = scmp.lt.s32.totalorder %s3367_s9, %s3361_s0 }
 0xd32   : > { %v1827_v42 = vmul.f32 %v2962_v1, %v1811_v43  ;;  %v1844_v6 = vadd.f32 %v2467_v3, %v1835_v2 }
 0xd33   : > { %p3370_p10 = por %p3369_p7, %p3368_p9 }
 0xd34   : > { %v1836_v5 = vmul.f32 %v2466_v63, %v1827_v42 }
 0xd35   : > { %p3371_p4 = pnand %p3370_p10, %p3364_p5 }
 0xd36   : > { %v1845_v10 = vadd.f32 %v2467_v3, %v1836_v5 }
 0xd38   : > { %v1846_v11 = vpack.c.bf16 %v1845_v10, %v1844_v6 }
 0xd3a   : > { %2673 = vmatmul.mubr.msk.bf16.vlgmr.msra.gmra.mrb[28].mxu0 %vm877_vm1, %v1846_v11 }
 0xd3b   : > { %2704 = vmatprep.mubr.msk.bf16.mxu0 %vm3474_vm0, %v3473_v0  ;;  %2697 = vmatpush3.bf16.msra.mxu0 %v2923_v44 }
 0xd3c   : > { %2698 = vmatprep.subr.bf16.mxu0 %v3473_v0 }
 0xd3f   : > { %2699 = vmatpush3.bf16.msra.mxu0 %v2924_v45 }
 0xd40   : > { %2700 = vmatprep.subr.bf16.mxu0 %v3473_v0 }
 0xd43   : > { %2701 = vmatpush3.bf16.msra.mxu0 %v2925_v8 }
 0xd44   : > { %2702 = vmatprep.subr.bf16.mxu0 %v3473_v0 }
 0xd47   : > { %2703 = vmatpush3.bf16.msra.mxu0 %v2926_v46 }
 0xe0d   : > { %v1923_v15 = vpop.f32.mrb[28].mxu0 }
 0xe0e   : > { %v1924_v16 = vadd.f32 %v2468_v14, %v1923_v15  ;;  %v2674_v17 = vpop.f32.mrb[29].mxu0 }
 0xe0f   : > { %v1926_v18 = vpop.f32.mrb[30].mxu0 }
 0xe10   : > { %v1927_v19 = vadd.f32 %v2468_v14, %v1926_v18  ;;  %v2675_v4 = vpop.f32.mrb[31].mxu0  ;;  %v1930_v20 = vmax.f32 %v1924_v16, 0.0 }
 0xe12   : > { %v1931_v21 = vmax.f32 %v1927_v19, 0.0 }
 0xe14   : > { %v1932_v22 = vpack.c.bf16 %v1931_v21, %v1930_v20 }
 0xe16   : > { %2693 = vmatmul.mubr.bf16.vlgmr.msra.gmra.mrb[32].mxu1 %v1932_v22 }
 0xee9   : > { %v2038_v23 = vpop.f32.mrb[32].mxu1 }
 0xeea   : > { %v2039_v24 = vadd.f32 %v2474_v7, %v2038_v23  ;;  %v2694_v25 = vpop.f32.mrb[33].mxu1 }
 0xeeb   : > { %v2041_v26 = vpop.f32.mrb[34].mxu1 }
 0xeec   : > { %v2042_v27 = vadd.f32 %v2474_v7, %v2041_v26  ;;  %v2695_v28 = vpop.f32.mrb[35].mxu1  ;;  %v2045_v29 = vadd.f32 %v2039_v24, %v1844_v6 }
 0xeee   : > { %v2047_v30 = vsel %vm877_vm1, %v2045_v29, 0.0  ;;  %v2046_v32 = vadd.f32 %v2042_v27, %v1845_v10 }
 0xeef   : > { %2048 = vadd.xlane.f32.xlu1 %v2047_v30 }
 0xef0   : > { %v2050_v33 = vsel %vm877_vm1, %v2046_v32, 0.0 }
 0xef1   : > { %2051 = vadd.xlane.f32.xlu0 %v2050_v33 }
 0xf7c   : > { %v2049_v35 = vpop.xlane.xlu1 %2048 }
 0xf7d   : > { %v2053_v36 = vmul.f32 0.015625, %v2049_v35 }
 0xf7e   : > { %v2052_v37 = vpop.xlane.xlu0 %2051 }
 0xf7f   : > { %v2055_v38 = vsub.f32 %v2045_v29, %v2053_v36  ;;  %v2054_v39 = vmul.f32 0.015625, %v2052_v37 }
 0xf81   : > { %v2056_v40 = vsub.f32 %v2046_v32, %v2054_v39  ;;  %v2057_v31 = vmul.f32 %v2055_v38, %v2055_v38 }
 0xf83   : > { %v2059_v34 = vsel %vm877_vm1, %v2057_v31, 0.0  ;;  %v2058_v41 = vmul.f32 %v2056_v40, %v2056_v40 }
 0xf84   : > { %2060 = vadd.xlane.f32.xlu0 %v2059_v34 }
 0xf85   : > { %v2062_v43 = vsel %vm877_vm1, %v2058_v41, 0.0 }
 0xf88   : > { %2063 = vadd.xlane.f32.xlu0 %v2062_v43 }
0x1011   : > { %v2061_v9 = vpop.xlane.xlu0 %2060 }
0x1012   : > { %v2065_v47 = vmul.f32 0.015625, %v2061_v9 }
0x1014   : > { %v2067_v48 = vadd.f32 1e-05, %v2065_v47 }
0x1015   : > { %v2064_v49 = vpop.xlane.xlu0 %2063 }
0x1016   : > { %2963 = vrsqrt.f32 %v2067_v48  ;;  %v2066_v50 = vmul.f32 0.015625, %v2064_v49 }
0x1018   : > { %v2068_v51 = vadd.f32 1e-05, %v2066_v50 }
0x101a   : > { %2965 = vrsqrt.f32 %v2068_v51 }
0x1020   : > { %v2964_v53 = vpop.eup %2963 }
0x1021   : > { %v2071_v54 = vmul.f32 %v2964_v53, %v2055_v38 }
0x1023   : > { %v2080_v57 = vmul.f32 %v2483_v55, %v2071_v54 }
0x1024   : > { %v2966_v56 = vpop.eup %2965 }
0x1025   : > { %v2072_v58 = vmul.f32 %v2966_v56, %v2056_v40  ;;  %v2089_v0 = vadd.f32 %v2484_v59, %v2080_v57 }
0x1027   : > { %v2081_v60 = vmul.f32 %v2483_v55, %v2072_v58 }
0x1029   : > { %v2090_v61 = vadd.f32 %v2484_v59, %v2081_v60 }
0x102b   : > { %v2091_v62 = vpack.c.bf16 %v2090_v61, %v2089_v0 }
0x102d   : > { %2705 = vmatmul.mubr.msk.bf16.vlgmr.msra.gmra.mrb[32].mxu0 %vm877_vm1, %v2091_v62 }
0x1100   : > { %v2168_v63 = vpop.f32.mrb[32].mxu0 }
0x1101   : > { %v2169_v1 = vadd.f32 %v2485_v52, %v2168_v63  ;;  %v2706_v2 = vpop.f32.mrb[33].mxu0 }
0x1102   : > { %v2171_v42 = vpop.f32.mrb[34].mxu0 }
0x1103   : > { %2175 = vst [vmem:[%s825_s26] sm:$0xff] %v2169_v1  ;;  %v2172_v3 = vadd.f32 %v2485_v52, %v2171_v42  ;;  %v2707_v5 = vpop.f32.mrb[35].mxu0 }
0x1105   : > { %2176 = vst [vmem:[%s825_s26 + $0x8] sm:$0xff] %v2172_v3 }
0x1106   : > { %3374 = shalt.err (!%p3371_p4)
}
0x1107   : > { %s3375_s26 = scalar_lea.hbm %s4254_s2, 256  ;;  %s3379_s18 = scalar_lea.hbm %s4393_s6, 512 }
0x1108   : > { %p3376_p13 = scmp.ne.s32.totalorder %s4254_s2, %s3375_s26  ;;  %p3380_p2 = scmp.lt.u32.totalorder %s4254_s2, %s4393_s6 }
0x1109   : > { %p3381_p0 = scmp.lt.u32.totalorder %s3379_s18, %s3375_s26  ;;  %p3383_p11 = scmp.lt.u32.totalorder %s3375_s26, %s4254_s2 }
0x110a   : > { %p3377_p1 = pnand %p3376_p13, %p4394_p12 }
0x110b   : > { %p3382_p6 = por %p3381_p0, %p3380_p2 }
0x110c   : > { %p3378_p3 = pneg %p3377_p1 }
0x110d   : > { %p3384_p8 = por %p3383_p11, %p3382_p6 }
0x110f   : > { %p3385_p5 = pnand %p3384_p8, %p3378_p3 }
0x1111   : > { %3388 = shalt.err (!%p3385_p5)
}
0x1112   : > { %s3480_s0 = smov 128   ;;  %s3481_s9 = smov 8  }
0x1113   : > { %2762 = dma.vmem_to_hbm [thread:$0]  (%p4394_p12), %s4249_s28, 256, %s4254_s2, %s2178_s5, %s3480_s0, %s3480_s0, %s3481_s9  }
0x1114 PF: > { %s4395_s27 = sld [smem:[#allocation35_spill]]  ;;  %p4396_p9 = scmp.ne.s32.totalorder %s4366_s1, 0 }
0x1115   : > { %p4397_p7 = scmp.ge.s32.totalorder %s3455_s24, 2 }
0x1117   : > { %p2809_p10 = pnand %p4397_p7, %p4396_p9 }
0x111a   : > { %s2206_s14 = sand.u32 1, %s4395_s27  }
0x111b   : > { %s2207_s26 = scalar_lea.sflag [#allocation4], %s2206_s14 }
0x111c   : > { %3438 = dma.done.wait (!%p2809_p10), %s2207_s26, 256  }
0x111d   : > { %3440 = vsyncadd (!%p2809_p10), %s2207_s26, 4294967040  ;;  %p40_p4 = scmp.ge.s32.totalorder %s3899_s4, 4   ;;  %s4398_s1 = smov %s3447_s22 }
0x111e   : > { %s4399_s22 = smov %s3451_s23  ;;  %s4400_s23 = smov %s3911_s21 }
0x111f   : > { %s4401_s24 = smov %s3899_s4  ;;  %42 = sbr.rel (!%p40_p4) target bundleno = 27 (0x1b), region = 200 }
0x1126   :  { %2212 = vsyncpa [#allocation3], 1 }
0x1127   :  { %2214 = vsyncpa [#allocation3 + $0x1], 1 }
0x1128   :  { %2215 = vsyncpa [#allocation6], 1 }
0x1129   :  { %2216 = vsyncpa [#allocation9], 1 }
0x112a   :  { %2217 = vsyncpa [#allocation12], 1 }
0x112b   :  { %2218 = vsyncpa [#allocation15], 1 }
0x112c   :  { %2219 = vsyncpa [#allocation18], 1 }
0x112d   :  { %2220 = vsyncpa [#allocation21], 1 }
0x112e   :  { %2221 = vsyncpa [#allocation24], 1 }
0x112f   :  { %2222 = vsyncpa [#allocation4], 1 }
0x1130   :  { %2224 = vsyncpa [#allocation4 + $0x1], 1 }

</bundles_post_ra>
